<compile_context>
chip_gen: v5e
topology: v5e:2x2
jax: 0.10.0
libtpu: 0.0.40
codegen_flags: <defaults>
</compile_context>

<pallas_src>
import functools
import numpy as np
import jax
import jax.numpy as jnp
from jax import lax
from jax.experimental import pallas as pl
from jax.experimental.pallas import tpu as pltpu


# --------------------------------------------------------------------------
# Fused kernel: BiLSTM + hidden2tag + Viterbi forward + on-device backtrace.
# --------------------------------------------------------------------------
def _crf2_kernel(xcat_ref, wih_ref, whh_ref, b_ref, wtag_ref, btag_ref,
                 trans_ref, trans_t_ref,
                 score_ref, path_ref, start_ref,
                 *, start_tag, stop_tag):
    T = xcat_ref.shape[0]
    H2 = whh_ref.shape[0]          # 2H  (packed [fwd H | bwd H] hidden state)
    H = H2 // 2
    L = trans_ref.shape[0]

    # ---- input projection: both directions, all gates, one MXU op ----
    pre = (jnp.dot(xcat_ref[...], wih_ref[...], preferred_element_type=jnp.float32)
           + b_ref[...])                                        # (T, 8H), stays in vregs

    # ---- fused bidirectional LSTM recurrence (fully unrolled; T static) ----
    whh = whh_ref[...]
    h = jnp.zeros((1, H2), jnp.float32)
    c = jnp.zeros((1, H2), jnp.float32)
    h_steps = []
    for s in range(T):
        gates = pre[s:s + 1, :] + jnp.dot(h, whh, preferred_element_type=jnp.float32)
        sg = jax.nn.sigmoid(gates)                # ONE EUP push over (1, 8H); G cols are 2x
        i_g = sg[:, 0:H2]
        f_g = sg[:, H2:2 * H2]
        g_g = 2.0 * sg[:, 2 * H2:3 * H2] - 1.0    # == tanh(raw G pre-activation)
        o_g = sg[:, 3 * H2:4 * H2]
        c = f_g * c + i_g * g_g
        h = o_g * jnp.tanh(c)
        h_steps.append(h)                         # (1, 2H) kept in vregs

    # assemble [h_fwd(t) | h_bwd(t)] in time order (no VMEM scratch)
    h_fwd = jnp.concatenate([h_steps[t][:, 0:H] for t in range(T)], axis=0)          # (T, H)
    h_bwd = jnp.concatenate([h_steps[T - 1 - t][:, H:H2] for t in range(T)], axis=0)  # (T, H)
    hcat = jnp.concatenate([h_fwd, h_bwd], axis=1)                                    # (T, 2H)

    # ---- hidden2tag (dropout is identity in eval mode) ----
    feats = (jnp.dot(hcat, wtag_ref[...], preferred_element_type=jnp.float32)
             + btag_ref[...])                     # (T, L)
    feats_t = jnp.transpose(feats)                # (L, T): column emissions for even steps

    # ---- Viterbi forward recursion: alternate fv orientation -> 1 XLU reduce / step ----
    lane = lax.broadcasted_iota(jnp.int32, (1, L), 1)
    subl = lax.broadcasted_iota(jnp.int32, (L, 1), 0)
    col_i = lax.broadcasted_iota(jnp.int32, (L, L), 1)
    row_i = lax.broadcasted_iota(jnp.int32, (L, L), 0)

    trans = trans_ref[...]                        # trans[prev, next]      ([from, to])
    trans_t = trans_t_ref[...]                    # trans_t[next, prev]

    fv = jnp.where(lane == start_tag, jnp.float32(0.0), jnp.float32(-10000.0))  # (1,L) by prev
    fv_is_row = True
    bps = []
    for t in range(T):
        if fv_is_row:
            # scores[next, prev] = trans_t + fv_row  (sublane broadcast)
            scores = trans_t + fv
            vmax = jnp.max(scores, axis=1, keepdims=True)                     # (L,1) by next
            bp = jnp.min(jnp.where(scores == vmax, col_i, L),
                         axis=1, keepdims=True)                               # (L,1) int32
            fv = vmax + feats_t[:, t:t + 1]                                   # column
            fv_is_row = False
        else:
            # scores[prev, next] = trans + fv_col  (lane broadcast)
            scores = trans + fv
            vmax = jnp.max(scores, axis=0, keepdims=True)                     # (1,L) by next
            bp = jnp.min(jnp.where(scores == vmax, row_i, L),
                         axis=0, keepdims=True)                               # (1,L) int32
            fv = vmax + feats[t:t + 1, :]                                     # row
            fv_is_row = True
        bps.append(bp)

    # ---- terminal: term[tag] = fv[tag] + trans[tag, STOP] ----
    if fv_is_row:
        term = fv + trans_t[stop_tag:stop_tag + 1, :]                         # (1, L)
        tmax = jnp.max(term, axis=1, keepdims=True)
        best = jnp.min(jnp.where(term == tmax, lane, L), axis=1, keepdims=True)
    else:
        term = fv + trans[:, stop_tag:stop_tag + 1]                           # (L, 1)
        tmax = jnp.max(term, axis=0, keepdims=True)
        best = jnp.min(jnp.where(term == tmax, subl, L), axis=0, keepdims=True)
    score_ref[...] = tmax

    # ---- on-device backtrace (fully unrolled; bps stay in vregs) ----
    lane_t = lax.broadcasted_iota(jnp.int32, (1, T), 1)
    path = jnp.where(lane_t == (T - 1), best, 0)                              # (1, T) int32
    for t in range(T - 1, 0, -1):
        bp = bps[t]
        if bp.shape[0] == L:   # column-oriented backpointers (even steps)
            best = jnp.sum(jnp.where(subl == best, bp, 0), axis=0, keepdims=True)
        else:                  # row-oriented backpointers (odd steps)
            best = jnp.sum(jnp.where(lane == best, bp, 0), axis=1, keepdims=True)
        path = jnp.where(lane_t == (t - 1), best, path)
    bp0 = bps[0]
    if bp0.shape[0] == L:
        start = jnp.sum(jnp.where(subl == best, bp0, 0), axis=0, keepdims=True)
    else:
        start = jnp.sum(jnp.where(lane == best, bp0, 0), axis=1, keepdims=True)

    path_ref[...] = path
    start_ref[...] = start


# --------------------------------------------------------------------------
# Jitted device wrapper: embedding gather + single fused pallas_call (no host sync).
# --------------------------------------------------------------------------
@functools.partial(jax.jit, static_argnames=("start_tag", "stop_tag"))
def _crf2_device(token_ids, emb, wih_blk, whh_blk, b_blk, wtag, btag, trans, trans_t,
                 *, start_tag, stop_tag):
    x = jnp.take(emb, token_ids, axis=0)                 # (T, E)   glue (not the hot path)
    xcat = jnp.concatenate([x, x[::-1]], axis=1)         # (T, 2E)  [x | reversed(x)]
    T = xcat.shape[0]

    # NOTE: total VMEM footprint is well under 1 MiB at these shapes; if T/H/L grow,
    # revisit pltpu.CompilerParams(vmem_limit_bytes=...) and tile the grid.
    score, path, start = pl.pallas_call(
        functools.partial(_crf2_kernel, start_tag=start_tag, stop_tag=stop_tag),
        out_shape=(jax.ShapeDtypeStruct((1, 1), jnp.float32),   # path score
                   jax.ShapeDtypeStruct((1, T), jnp.int32),     # best path
                   jax.ShapeDtypeStruct((1, 1), jnp.int32)),    # start-tag check
        in_specs=[pl.BlockSpec(memory_space=pltpu.MemorySpace.VMEM)] * 8,
        out_specs=(pl.BlockSpec(memory_space=pltpu.MemorySpace.VMEM),
                   pl.BlockSpec(memory_space=pltpu.MemorySpace.VMEM),
                   pl.BlockSpec(memory_space=pltpu.MemorySpace.VMEM)),
    )(xcat, wih_blk, whh_blk, b_blk, wtag, btag, trans, trans_t)
    return score[0, 0], path[0], start[0, 0]


def crf2_forward(token_ids, p):
    """Equivalent of CRF2.forward: returns device-resident (score, best_path, start_tag)."""
    return _crf2_device(
        token_ids, p["embedding"], p["wih_blk"], p["whh_blk"], p["b_blk"],
        p["wtag"], p["btag"], p["trans"], p["trans_t"],
        start_tag=p["start_tag"], stop_tag=p["stop_tag"])


# --------------------------------------------------------------------------
# Parameter init: PyTorch-shaped weights, packed into the fused block layout.
# --------------------------------------------------------------------------
def init_params(key, vocab, emb_dim, hidden, label_size, padding_idx):
    ks = jax.random.split(key, 12)
    H, E, L = hidden, emb_dim, label_size
    k_lstm = 1.0 / np.sqrt(H)
    k_lin = 1.0 / np.sqrt(2 * H)

    def u(k, shape, bound):
        # np.array(...) makes a WRITABLE host copy (np.asarray of a jax array is read-only)
        return np.array(jax.random.uniform(k, shape, jnp.float32, -bound, bound))

    emb = np.array(jax.random.normal(ks[0], (vocab, E), jnp.float32))
    emb[padding_idx] = 0.0

    # PyTorch LSTM layout: rows = [i, f, g, o] blocks of size H
    wih_f = u(ks[1], (4 * H, E), k_lstm)
    whh_f = u(ks[2], (4 * H, H), k_lstm)
    b_f = u(ks[3], (4 * H,), k_lstm) + u(ks[4], (4 * H,), k_lstm)
    wih_b = u(ks[5], (4 * H, E), k_lstm)
    whh_b = u(ks[6], (4 * H, H), k_lstm)
    b_b = u(ks[7], (4 * H,), k_lstm) + u(ks[8], (4 * H,), k_lstm)

    # Fused block layout: gate columns [I | F | G | O], each 2H wide = [fwd H | bwd H].
    # LHS layouts: xcat = [x | x_rev] (2E), h = [h_f | h_b] (2H); zero blocks keep the
    # directions independent so one matmul does both recurrences.
    # The G block is pre-scaled by 2 so the kernel uses ONE sigmoid over all gates and
    # recovers tanh(x) = 2*sigmoid(2x) - 1.
    wih_blk = np.zeros((2 * E, 8 * H), np.float32)
    whh_blk = np.zeros((2 * H, 8 * H), np.float32)
    b_blk = np.zeros((1, 8 * H), np.float32)
    for gi in range(4):
        scale = 2.0 if gi == 2 else 1.0
        dst_f = slice(gi * 2 * H, gi * 2 * H + H)
        dst_b = slice(gi * 2 * H + H, (gi + 1) * 2 * H)
        src = slice(gi * H, (gi + 1) * H)
        wih_blk[0:E, dst_f] = scale * wih_f[src, :].T
        wih_blk[E:2 * E, dst_b] = scale * wih_b[src, :].T
        whh_blk[0:H, dst_f] = scale * whh_f[src, :].T
        whh_blk[H:2 * H, dst_b] = scale * whh_b[src, :].T
        b_blk[0, dst_f] = scale * b_f[src]
        b_blk[0, dst_b] = scale * b_b[src]

    wtag_w = u(ks[9], (L, 2 * H), k_lin)                  # PyTorch Linear weight (L, 2H)
    btag = u(ks[10], (L,), k_lin)

    start_tag, stop_tag = L - 2, L - 1
    trans = np.array(jax.random.normal(ks[11], (L, L), jnp.float32))   # trans[from, to]
    trans[:, start_tag] = -10000.0
    trans[stop_tag, :] = -10000.0
    trans_t = np.ascontiguousarray(trans.T)               # trans_t[to, from]

    return dict(
        embedding=jnp.asarray(emb),
        wih_blk=jnp.asarray(wih_blk), whh_blk=jnp.asarray(whh_blk), b_blk=jnp.asarray(b_blk),
        wtag=jnp.asarray(wtag_w.T), btag=jnp.asarray(btag.reshape(1, L)),
        trans=jnp.asarray(trans), trans_t=jnp.asarray(trans_t),
        start_tag=start_tag, stop_tag=stop_tag,
        _raw=dict(emb=emb, wih_f=wih_f, whh_f=whh_f, b_f=b_f,
                  wih_b=wih_b, whh_b=whh_b, b_b=b_b,
                  wtag_w=wtag_w, btag=btag, trans=trans),
    )


# --------------------------------------------------------------------------
# Pure numpy reference (mirrors the PyTorch module exactly) for parity checking.
# --------------------------------------------------------------------------
def _reference_forward(token_ids, p):
    raw = p["_raw"]
    start_tag, stop_tag = p["start_tag"], p["stop_tag"]
    ids = np.asarray(token_ids)
    x = raw["emb"][ids].astype(np.float32)                 # (T, E)
    T = x.shape[0]

    def sigmoid(v):
        return 1.0 / (1.0 + np.exp(-v))

    def run_dir(xs, wih, whh, b):
        H = whh.shape[1]
        h = np.zeros((H,), np.float32)
        c = np.zeros((H,), np.float32)
        outs = []
        for t in range(xs.shape[0]):
            g = wih @ xs[t] + whh @ h + b
            i, f = sigmoid(g[0:H]), sigmoid(g[H:2 * H])
            gg, o = np.tanh(g[2 * H:3 * H]), sigmoid(g[3 * H:4 * H])
            c = f * c + i * gg
            h = o * np.tanh(c)
            outs.append(h)
        return np.stack(outs)

    hf = run_dir(x, raw["wih_f"], raw["whh_f"], raw["b_f"])
    hb = run_dir(x[::-1], raw["wih_b"], raw["whh_b"], raw["b_b"])[::-1]
    feats = np.concatenate([hf, hb], axis=1) @ raw["wtag_w"].T + raw["btag"]   # (T, L)

    trans = raw["trans"]
    L = trans.shape[0]
    fv = np.full((L,), -10000.0, np.float32)
    fv[start_tag] = 0.0
    bps = []
    for t in range(T):
        cand = fv[:, None] + trans                         # [prev, next]
        bp = np.argmax(cand, axis=0)
        fv = cand[bp, np.arange(L)] + feats[t]
        bps.append(bp)
    term = fv + trans[:, stop_tag]
    best = int(np.argmax(term))
    score = float(term[best])
    path = [best]
    for bp in reversed(bps):
        best = int(bp[best])
        path.append(best)
    start = path.pop()
    path.reverse()
    return score, path, start


if __name__ == "__main__":
    # small shapes consistent with the module's forward (batch dim of 1 squeezed)
    T = 8            # sequence length
    E = 32           # embedding_dim
    H = 32           # config.hidden_size  (config.num_layers = 1)
    L = 8            # label_size (START=6, STOP=7)
    V = 50           # num_embeddings
    PAD = 0          # padding_idx

    key = jax.random.PRNGKey(0)
    k_p, k_ids = jax.random.split(key)
    params = init_params(k_p, V, E, H, L, PAD)
    token_ids = jax.random.randint(k_ids, (T,), 1, V, dtype=jnp.int32)

    score_d, path_d, start_d = crf2_forward(token_ids, params)
    jax.block_until_ready((score_d, path_d, start_d))      # single host sync

    score = float(score_d)
    path = [int(v) for v in np.asarray(path_d)]
    start = int(start_d)

    ref_score, ref_path, ref_start = _reference_forward(token_ids, params)

    assert start == params["start_tag"], (start, params["start_tag"])
    assert ref_start == params["start_tag"]
    assert np.isfinite(score)
    assert len(path) == T and all(0 <= t < L for t in path)
    assert path == ref_path, (path, ref_path)
    assert abs(score - ref_score) < 1e-3 * max(1.0, abs(ref_score)), (score, ref_score)
    print("KERNEL_OK")
</pallas_src>

<mosaic_0001>
module attributes {stable_mosaic.version = 11 : i64} {
  func.func @_crf2_kernel(%arg0: memref<8x64xf32, #tpu.memory_space<vmem>>, %arg1: memref<64x256xf32, #tpu.memory_space<vmem>>, %arg2: memref<64x256xf32, #tpu.memory_space<vmem>>, %arg3: memref<1x256xf32, #tpu.memory_space<vmem>>, %arg4: memref<64x8xf32, #tpu.memory_space<vmem>>, %arg5: memref<1x8xf32, #tpu.memory_space<vmem>>, %arg6: memref<8x8xf32, #tpu.memory_space<vmem>>, %arg7: memref<8x8xf32, #tpu.memory_space<vmem>>, %arg8: memref<1x1xf32, #tpu.memory_space<vmem>>, %arg9: memref<1x8xi32, #tpu.memory_space<vmem>>, %arg10: memref<1x1xi32, #tpu.memory_space<vmem>>) attributes {dimension_semantics = [], scalar_prefetch = 0 : i64, scratch_operands = 0 : i64, tpu.core_type = #tpu.core_type<tc>} {
    %c0 = arith.constant 0 : index
    %c0_0 = arith.constant 0 : index
    %0 = vector.load %arg0[%c0, %c0_0] : memref<8x64xf32, #tpu.memory_space<vmem>>, vector<8x64xf32>
    %c0_1 = arith.constant 0 : index
    %c0_2 = arith.constant 0 : index
    %1 = vector.load %arg1[%c0_1, %c0_2] : memref<64x256xf32, #tpu.memory_space<vmem>>, vector<64x256xf32>
    %cst = arith.constant dense<0.000000e+00> : vector<8x256xf32>
    %2 = tpu.matmul %0, %1, %cst {dimension_numbers = #tpu.dot_dimension_numbers<[1], [0], [0], [1], [0, 0, 1, 1], [], []>} : vector<8x64xf32>, vector<64x256xf32>, vector<8x256xf32> -> vector<8x256xf32>
    %c0_3 = arith.constant 0 : index
    %c0_4 = arith.constant 0 : index
    %3 = vector.load %arg3[%c0_3, %c0_4] : memref<1x256xf32, #tpu.memory_space<vmem>>, vector<1x256xf32>
    %4 = vector.broadcast %3 : vector<1x256xf32> to vector<8x256xf32>
    %5 = arith.addf %2, %4 : vector<8x256xf32>
    %c0_5 = arith.constant 0 : index
    %c0_6 = arith.constant 0 : index
    %6 = vector.load %arg2[%c0_5, %c0_6] : memref<64x256xf32, #tpu.memory_space<vmem>>, vector<64x256xf32>
    %cst_7 = arith.constant 0.000000e+00 : f32
    %7 = vector.broadcast %cst_7 : f32 to vector<1x64xf32>
    %cst_8 = arith.constant 0.000000e+00 : f32
    %8 = vector.broadcast %cst_8 : f32 to vector<1x64xf32>
    %9 = vector.extract_strided_slice %5 {offsets = [0, 0], sizes = [1, 256], strides = [1, 1]} : vector<8x256xf32> to vector<1x256xf32>
    %cst_9 = arith.constant dense<0.000000e+00> : vector<1x256xf32>
    %10 = tpu.matmul %7, %6, %cst_9 {dimension_numbers = #tpu.dot_dimension_numbers<[1], [0], [0], [1], [0, 0, 1, 1], [], []>} : vector<1x64xf32>, vector<64x256xf32>, vector<1x256xf32> -> vector<1x256xf32>
    %11 = arith.addf %9, %10 : vector<1x256xf32>
    %12 = arith.negf %11 : vector<1x256xf32>
    %13 = math.exp %12 : vector<1x256xf32>
    %cst_10 = arith.constant 1.000000e+00 : f32
    %14 = vector.broadcast %cst_10 : f32 to vector<1x256xf32>
    %15 = arith.addf %14, %13 : vector<1x256xf32>
    %16 = arith.divf %14, %15 : vector<1x256xf32>
    %17 = vector.extract_strided_slice %16 {offsets = [0, 0], sizes = [1, 64], strides = [1, 1]} : vector<1x256xf32> to vector<1x64xf32>
    %18 = vector.extract_strided_slice %16 {offsets = [0, 64], sizes = [1, 64], strides = [1, 1]} : vector<1x256xf32> to vector<1x64xf32>
    %19 = vector.extract_strided_slice %16 {offsets = [0, 128], sizes = [1, 64], strides = [1, 1]} : vector<1x256xf32> to vector<1x64xf32>
    %cst_11 = arith.constant 2.000000e+00 : f32
    %20 = vector.broadcast %cst_11 : f32 to vector<1x64xf32>
    %21 = arith.mulf %20, %19 : vector<1x64xf32>
    %cst_12 = arith.constant 1.000000e+00 : f32
    %22 = vector.broadcast %cst_12 : f32 to vector<1x64xf32>
    %23 = arith.subf %21, %22 : vector<1x64xf32>
    %24 = vector.extract_strided_slice %16 {offsets = [0, 192], sizes = [1, 64], strides = [1, 1]} : vector<1x256xf32> to vector<1x64xf32>
    %25 = arith.mulf %18, %8 : vector<1x64xf32>
    %26 = arith.mulf %17, %23 : vector<1x64xf32>
    %27 = arith.addf %25, %26 : vector<1x64xf32>
    %28 = math.tanh %27 : vector<1x64xf32>
    %29 = arith.mulf %24, %28 : vector<1x64xf32>
    %30 = vector.extract_strided_slice %5 {offsets = [1, 0], sizes = [1, 256], strides = [1, 1]} : vector<8x256xf32> to vector<1x256xf32>
    %cst_13 = arith.constant dense<0.000000e+00> : vector<1x256xf32>
    %31 = tpu.matmul %29, %6, %cst_13 {dimension_numbers = #tpu.dot_dimension_numbers<[1], [0], [0], [1], [0, 0, 1, 1], [], []>} : vector<1x64xf32>, vector<64x256xf32>, vector<1x256xf32> -> vector<1x256xf32>
    %32 = arith.addf %30, %31 : vector<1x256xf32>
    %33 = arith.negf %32 : vector<1x256xf32>
    %34 = math.exp %33 : vector<1x256xf32>
    %cst_14 = arith.constant 1.000000e+00 : f32
    %35 = vector.broadcast %cst_14 : f32 to vector<1x256xf32>
    %36 = arith.addf %35, %34 : vector<1x256xf32>
    %37 = arith.divf %35, %36 : vector<1x256xf32>
    %38 = vector.extract_strided_slice %37 {offsets = [0, 0], sizes = [1, 64], strides = [1, 1]} : vector<1x256xf32> to vector<1x64xf32>
    %39 = vector.extract_strided_slice %37 {offsets = [0, 64], sizes = [1, 64], strides = [1, 1]} : vector<1x256xf32> to vector<1x64xf32>
    %40 = vector.extract_strided_slice %37 {offsets = [0, 128], sizes = [1, 64], strides = [1, 1]} : vector<1x256xf32> to vector<1x64xf32>
    %cst_15 = arith.constant 2.000000e+00 : f32
    %41 = vector.broadcast %cst_15 : f32 to vector<1x64xf32>
    %42 = arith.mulf %41, %40 : vector<1x64xf32>
    %cst_16 = arith.constant 1.000000e+00 : f32
    %43 = vector.broadcast %cst_16 : f32 to vector<1x64xf32>
    %44 = arith.subf %42, %43 : vector<1x64xf32>
    %45 = vector.extract_strided_slice %37 {offsets = [0, 192], sizes = [1, 64], strides = [1, 1]} : vector<1x256xf32> to vector<1x64xf32>
    %46 = arith.mulf %39, %27 : vector<1x64xf32>
    %47 = arith.mulf %38, %44 : vector<1x64xf32>
    %48 = arith.addf %46, %47 : vector<1x64xf32>
    %49 = math.tanh %48 : vector<1x64xf32>
    %50 = arith.mulf %45, %49 : vector<1x64xf32>
    %51 = vector.extract_strided_slice %5 {offsets = [2, 0], sizes = [1, 256], strides = [1, 1]} : vector<8x256xf32> to vector<1x256xf32>
    %cst_17 = arith.constant dense<0.000000e+00> : vector<1x256xf32>
    %52 = tpu.matmul %50, %6, %cst_17 {dimension_numbers = #tpu.dot_dimension_numbers<[1], [0], [0], [1], [0, 0, 1, 1], [], []>} : vector<1x64xf32>, vector<64x256xf32>, vector<1x256xf32> -> vector<1x256xf32>
    %53 = arith.addf %51, %52 : vector<1x256xf32>
    %54 = arith.negf %53 : vector<1x256xf32>
    %55 = math.exp %54 : vector<1x256xf32>
    %cst_18 = arith.constant 1.000000e+00 : f32
    %56 = vector.broadcast %cst_18 : f32 to vector<1x256xf32>
    %57 = arith.addf %56, %55 : vector<1x256xf32>
    %58 = arith.divf %56, %57 : vector<1x256xf32>
    %59 = vector.extract_strided_slice %58 {offsets = [0, 0], sizes = [1, 64], strides = [1, 1]} : vector<1x256xf32> to vector<1x64xf32>
    %60 = vector.extract_strided_slice %58 {offsets = [0, 64], sizes = [1, 64], strides = [1, 1]} : vector<1x256xf32> to vector<1x64xf32>
    %61 = vector.extract_strided_slice %58 {offsets = [0, 128], sizes = [1, 64], strides = [1, 1]} : vector<1x256xf32> to vector<1x64xf32>
    %cst_19 = arith.constant 2.000000e+00 : f32
    %62 = vector.broadcast %cst_19 : f32 to vector<1x64xf32>
    %63 = arith.mulf %62, %61 : vector<1x64xf32>
    %cst_20 = arith.constant 1.000000e+00 : f32
    %64 = vector.broadcast %cst_20 : f32 to vector<1x64xf32>
    %65 = arith.subf %63, %64 : vector<1x64xf32>
    %66 = vector.extract_strided_slice %58 {offsets = [0, 192], sizes = [1, 64], strides = [1, 1]} : vector<1x256xf32> to vector<1x64xf32>
    %67 = arith.mulf %60, %48 : vector<1x64xf32>
    %68 = arith.mulf %59, %65 : vector<1x64xf32>
    %69 = arith.addf %67, %68 : vector<1x64xf32>
    %70 = math.tanh %69 : vector<1x64xf32>
    %71 = arith.mulf %66, %70 : vector<1x64xf32>
    %72 = vector.extract_strided_slice %5 {offsets = [3, 0], sizes = [1, 256], strides = [1, 1]} : vector<8x256xf32> to vector<1x256xf32>
    %cst_21 = arith.constant dense<0.000000e+00> : vector<1x256xf32>
    %73 = tpu.matmul %71, %6, %cst_21 {dimension_numbers = #tpu.dot_dimension_numbers<[1], [0], [0], [1], [0, 0, 1, 1], [], []>} : vector<1x64xf32>, vector<64x256xf32>, vector<1x256xf32> -> vector<1x256xf32>
    %74 = arith.addf %72, %73 : vector<1x256xf32>
    %75 = arith.negf %74 : vector<1x256xf32>
    %76 = math.exp %75 : vector<1x256xf32>
    %cst_22 = arith.constant 1.000000e+00 : f32
    %77 = vector.broadcast %cst_22 : f32 to vector<1x256xf32>
    %78 = arith.addf %77, %76 : vector<1x256xf32>
    %79 = arith.divf %77, %78 : vector<1x256xf32>
    %80 = vector.extract_strided_slice %79 {offsets = [0, 0], sizes = [1, 64], strides = [1, 1]} : vector<1x256xf32> to vector<1x64xf32>
    %81 = vector.extract_strided_slice %79 {offsets = [0, 64], sizes = [1, 64], strides = [1, 1]} : vector<1x256xf32> to vector<1x64xf32>
    %82 = vector.extract_strided_slice %79 {offsets = [0, 128], sizes = [1, 64], strides = [1, 1]} : vector<1x256xf32> to vector<1x64xf32>
    %cst_23 = arith.constant 2.000000e+00 : f32
    %83 = vector.broadcast %cst_23 : f32 to vector<1x64xf32>
    %84 = arith.mulf %83, %82 : vector<1x64xf32>
    %cst_24 = arith.constant 1.000000e+00 : f32
    %85 = vector.broadcast %cst_24 : f32 to vector<1x64xf32>
    %86 = arith.subf %84, %85 : vector<1x64xf32>
    %87 = vector.extract_strided_slice %79 {offsets = [0, 192], sizes = [1, 64], strides = [1, 1]} : vector<1x256xf32> to vector<1x64xf32>
    %88 = arith.mulf %81, %69 : vector<1x64xf32>
    %89 = arith.mulf %80, %86 : vector<1x64xf32>
    %90 = arith.addf %88, %89 : vector<1x64xf32>
    %91 = math.tanh %90 : vector<1x64xf32>
    %92 = arith.mulf %87, %91 : vector<1x64xf32>
    %93 = vector.extract_strided_slice %5 {offsets = [4, 0], sizes = [1, 256], strides = [1, 1]} : vector<8x256xf32> to vector<1x256xf32>
    %cst_25 = arith.constant dense<0.000000e+00> : vector<1x256xf32>
    %94 = tpu.matmul %92, %6, %cst_25 {dimension_numbers = #tpu.dot_dimension_numbers<[1], [0], [0], [1], [0, 0, 1, 1], [], []>} : vector<1x64xf32>, vector<64x256xf32>, vector<1x256xf32> -> vector<1x256xf32>
    %95 = arith.addf %93, %94 : vector<1x256xf32>
    %96 = arith.negf %95 : vector<1x256xf32>
    %97 = math.exp %96 : vector<1x256xf32>
    %cst_26 = arith.constant 1.000000e+00 : f32
    %98 = vector.broadcast %cst_26 : f32 to vector<1x256xf32>
    %99 = arith.addf %98, %97 : vector<1x256xf32>
    %100 = arith.divf %98, %99 : vector<1x256xf32>
    %101 = vector.extract_strided_slice %100 {offsets = [0, 0], sizes = [1, 64], strides = [1, 1]} : vector<1x256xf32> to vector<1x64xf32>
    %102 = vector.extract_strided_slice %100 {offsets = [0, 64], sizes = [1, 64], strides = [1, 1]} : vector<1x256xf32> to vector<1x64xf32>
    %103 = vector.extract_strided_slice %100 {offsets = [0, 128], sizes = [1, 64], strides = [1, 1]} : vector<1x256xf32> to vector<1x64xf32>
    %cst_27 = arith.constant 2.000000e+00 : f32
    %104 = vector.broadcast %cst_27 : f32 to vector<1x64xf32>
    %105 = arith.mulf %104, %103 : vector<1x64xf32>
    %cst_28 = arith.constant 1.000000e+00 : f32
    %106 = vector.broadcast %cst_28 : f32 to vector<1x64xf32>
    %107 = arith.subf %105, %106 : vector<1x64xf32>
    %108 = vector.extract_strided_slice %100 {offsets = [0, 192], sizes = [1, 64], strides = [1, 1]} : vector<1x256xf32> to vector<1x64xf32>
    %109 = arith.mulf %102, %90 : vector<1x64xf32>
    %110 = arith.mulf %101, %107 : vector<1x64xf32>
    %111 = arith.addf %109, %110 : vector<1x64xf32>
    %112 = math.tanh %111 : vector<1x64xf32>
    %113 = arith.mulf %108, %112 : vector<1x64xf32>
    %114 = vector.extract_strided_slice %5 {offsets = [5, 0], sizes = [1, 256], strides = [1, 1]} : vector<8x256xf32> to vector<1x256xf32>
    %cst_29 = arith.constant dense<0.000000e+00> : vector<1x256xf32>
    %115 = tpu.matmul %113, %6, %cst_29 {dimension_numbers = #tpu.dot_dimension_numbers<[1], [0], [0], [1], [0, 0, 1, 1], [], []>} : vector<1x64xf32>, vector<64x256xf32>, vector<1x256xf32> -> vector<1x256xf32>
    %116 = arith.addf %114, %115 : vector<1x256xf32>
    %117 = arith.negf %116 : vector<1x256xf32>
    %118 = math.exp %117 : vector<1x256xf32>
    %cst_30 = arith.constant 1.000000e+00 : f32
    %119 = vector.broadcast %cst_30 : f32 to vector<1x256xf32>
    %120 = arith.addf %119, %118 : vector<1x256xf32>
    %121 = arith.divf %119, %120 : vector<1x256xf32>
    %122 = vector.extract_strided_slice %121 {offsets = [0, 0], sizes = [1, 64], strides = [1, 1]} : vector<1x256xf32> to vector<1x64xf32>
    %123 = vector.extract_strided_slice %121 {offsets = [0, 64], sizes = [1, 64], strides = [1, 1]} : vector<1x256xf32> to vector<1x64xf32>
    %124 = vector.extract_strided_slice %121 {offsets = [0, 128], sizes = [1, 64], strides = [1, 1]} : vector<1x256xf32> to vector<1x64xf32>
    %cst_31 = arith.constant 2.000000e+00 : f32
    %125 = vector.broadcast %cst_31 : f32 to vector<1x64xf32>
    %126 = arith.mulf %125, %124 : vector<1x64xf32>
    %cst_32 = arith.constant 1.000000e+00 : f32
    %127 = vector.broadcast %cst_32 : f32 to vector<1x64xf32>
    %128 = arith.subf %126, %127 : vector<1x64xf32>
    %129 = vector.extract_strided_slice %121 {offsets = [0, 192], sizes = [1, 64], strides = [1, 1]} : vector<1x256xf32> to vector<1x64xf32>
    %130 = arith.mulf %123, %111 : vector<1x64xf32>
    %131 = arith.mulf %122, %128 : vector<1x64xf32>
    %132 = arith.addf %130, %131 : vector<1x64xf32>
    %133 = math.tanh %132 : vector<1x64xf32>
    %134 = arith.mulf %129, %133 : vector<1x64xf32>
    %135 = vector.extract_strided_slice %5 {offsets = [6, 0], sizes = [1, 256], strides = [1, 1]} : vector<8x256xf32> to vector<1x256xf32>
    %cst_33 = arith.constant dense<0.000000e+00> : vector<1x256xf32>
    %136 = tpu.matmul %134, %6, %cst_33 {dimension_numbers = #tpu.dot_dimension_numbers<[1], [0], [0], [1], [0, 0, 1, 1], [], []>} : vector<1x64xf32>, vector<64x256xf32>, vector<1x256xf32> -> vector<1x256xf32>
    %137 = arith.addf %135, %136 : vector<1x256xf32>
    %138 = arith.negf %137 : vector<1x256xf32>
    %139 = math.exp %138 : vector<1x256xf32>
    %cst_34 = arith.constant 1.000000e+00 : f32
    %140 = vector.broadcast %cst_34 : f32 to vector<1x256xf32>
    %141 = arith.addf %140, %139 : vector<1x256xf32>
    %142 = arith.divf %140, %141 : vector<1x256xf32>
    %143 = vector.extract_strided_slice %142 {offsets = [0, 0], sizes = [1, 64], strides = [1, 1]} : vector<1x256xf32> to vector<1x64xf32>
    %144 = vector.extract_strided_slice %142 {offsets = [0, 64], sizes = [1, 64], strides = [1, 1]} : vector<1x256xf32> to vector<1x64xf32>
    %145 = vector.extract_strided_slice %142 {offsets = [0, 128], sizes = [1, 64], strides = [1, 1]} : vector<1x256xf32> to vector<1x64xf32>
    %cst_35 = arith.constant 2.000000e+00 : f32
    %146 = vector.broadcast %cst_35 : f32 to vector<1x64xf32>
    %147 = arith.mulf %146, %145 : vector<1x64xf32>
    %cst_36 = arith.constant 1.000000e+00 : f32
    %148 = vector.broadcast %cst_36 : f32 to vector<1x64xf32>
    %149 = arith.subf %147, %148 : vector<1x64xf32>
    %150 = vector.extract_strided_slice %142 {offsets = [0, 192], sizes = [1, 64], strides = [1, 1]} : vector<1x256xf32> to vector<1x64xf32>
    %151 = arith.mulf %144, %132 : vector<1x64xf32>
    %152 = arith.mulf %143, %149 : vector<1x64xf32>
    %153 = arith.addf %151, %152 : vector<1x64xf32>
    %154 = math.tanh %153 : vector<1x64xf32>
    %155 = arith.mulf %150, %154 : vector<1x64xf32>
    %156 = vector.extract_strided_slice %5 {offsets = [7, 0], sizes = [1, 256], strides = [1, 1]} : vector<8x256xf32> to vector<1x256xf32>
    %cst_37 = arith.constant dense<0.000000e+00> : vector<1x256xf32>
    %157 = tpu.matmul %155, %6, %cst_37 {dimension_numbers = #tpu.dot_dimension_numbers<[1], [0], [0], [1], [0, 0, 1, 1], [], []>} : vector<1x64xf32>, vector<64x256xf32>, vector<1x256xf32> -> vector<1x256xf32>
    %158 = arith.addf %156, %157 : vector<1x256xf32>
    %159 = arith.negf %158 : vector<1x256xf32>
    %160 = math.exp %159 : vector<1x256xf32>
    %cst_38 = arith.constant 1.000000e+00 : f32
    %161 = vector.broadcast %cst_38 : f32 to vector<1x256xf32>
    %162 = arith.addf %161, %160 : vector<1x256xf32>
    %163 = arith.divf %161, %162 : vector<1x256xf32>
    %164 = vector.extract_strided_slice %163 {offsets = [0, 0], sizes = [1, 64], strides = [1, 1]} : vector<1x256xf32> to vector<1x64xf32>
    %165 = vector.extract_strided_slice %163 {offsets = [0, 64], sizes = [1, 64], strides = [1, 1]} : vector<1x256xf32> to vector<1x64xf32>
    %166 = vector.extract_strided_slice %163 {offsets = [0, 128], sizes = [1, 64], strides = [1, 1]} : vector<1x256xf32> to vector<1x64xf32>
    %cst_39 = arith.constant 2.000000e+00 : f32
    %167 = vector.broadcast %cst_39 : f32 to vector<1x64xf32>
    %168 = arith.mulf %167, %166 : vector<1x64xf32>
    %cst_40 = arith.constant 1.000000e+00 : f32
    %169 = vector.broadcast %cst_40 : f32 to vector<1x64xf32>
    %170 = arith.subf %168, %169 : vector<1x64xf32>
    %171 = vector.extract_strided_slice %163 {offsets = [0, 192], sizes = [1, 64], strides = [1, 1]} : vector<1x256xf32> to vector<1x64xf32>
    %172 = arith.mulf %165, %153 : vector<1x64xf32>
    %173 = arith.mulf %164, %170 : vector<1x64xf32>
    %174 = arith.addf %172, %173 : vector<1x64xf32>
    %175 = math.tanh %174 : vector<1x64xf32>
    %176 = arith.mulf %171, %175 : vector<1x64xf32>
    %177 = vector.extract_strided_slice %29 {offsets = [0, 0], sizes = [1, 32], strides = [1, 1]} : vector<1x64xf32> to vector<1x32xf32>
    %178 = vector.extract_strided_slice %50 {offsets = [0, 0], sizes = [1, 32], strides = [1, 1]} : vector<1x64xf32> to vector<1x32xf32>
    %179 = vector.extract_strided_slice %71 {offsets = [0, 0], sizes = [1, 32], strides = [1, 1]} : vector<1x64xf32> to vector<1x32xf32>
    %180 = vector.extract_strided_slice %92 {offsets = [0, 0], sizes = [1, 32], strides = [1, 1]} : vector<1x64xf32> to vector<1x32xf32>
    %181 = vector.extract_strided_slice %113 {offsets = [0, 0], sizes = [1, 32], strides = [1, 1]} : vector<1x64xf32> to vector<1x32xf32>
    %182 = vector.extract_strided_slice %134 {offsets = [0, 0], sizes = [1, 32], strides = [1, 1]} : vector<1x64xf32> to vector<1x32xf32>
    %183 = vector.extract_strided_slice %155 {offsets = [0, 0], sizes = [1, 32], strides = [1, 1]} : vector<1x64xf32> to vector<1x32xf32>
    %184 = vector.extract_strided_slice %176 {offsets = [0, 0], sizes = [1, 32], strides = [1, 1]} : vector<1x64xf32> to vector<1x32xf32>
    %185 = tpu.concatenate %177, %178, %179, %180, %181, %182, %183, %184 in 0 : vector<1x32xf32>, vector<1x32xf32>, vector<1x32xf32>, vector<1x32xf32>, vector<1x32xf32>, vector<1x32xf32>, vector<1x32xf32>, vector<1x32xf32> -> vector<8x32xf32>
    %186 = vector.extract_strided_slice %176 {offsets = [0, 32], sizes = [1, 32], strides = [1, 1]} : vector<1x64xf32> to vector<1x32xf32>
    %187 = vector.extract_strided_slice %155 {offsets = [0, 32], sizes = [1, 32], strides = [1, 1]} : vector<1x64xf32> to vector<1x32xf32>
    %188 = vector.extract_strided_slice %134 {offsets = [0, 32], sizes = [1, 32], strides = [1, 1]} : vector<1x64xf32> to vector<1x32xf32>
    %189 = vector.extract_strided_slice %113 {offsets = [0, 32], sizes = [1, 32], strides = [1, 1]} : vector<1x64xf32> to vector<1x32xf32>
    %190 = vector.extract_strided_slice %92 {offsets = [0, 32], sizes = [1, 32], strides = [1, 1]} : vector<1x64xf32> to vector<1x32xf32>
    %191 = vector.extract_strided_slice %71 {offsets = [0, 32], sizes = [1, 32], strides = [1, 1]} : vector<1x64xf32> to vector<1x32xf32>
    %192 = vector.extract_strided_slice %50 {offsets = [0, 32], sizes = [1, 32], strides = [1, 1]} : vector<1x64xf32> to vector<1x32xf32>
    %193 = vector.extract_strided_slice %29 {offsets = [0, 32], sizes = [1, 32], strides = [1, 1]} : vector<1x64xf32> to vector<1x32xf32>
    %194 = tpu.concatenate %186, %187, %188, %189, %190, %191, %192, %193 in 0 : vector<1x32xf32>, vector<1x32xf32>, vector<1x32xf32>, vector<1x32xf32>, vector<1x32xf32>, vector<1x32xf32>, vector<1x32xf32>, vector<1x32xf32> -> vector<8x32xf32>
    %195 = tpu.concatenate %185, %194 in 1 : vector<8x32xf32>, vector<8x32xf32> -> vector<8x64xf32>
    %c0_41 = arith.constant 0 : index
    %c0_42 = arith.constant 0 : index
    %196 = vector.load %arg4[%c0_41, %c0_42] : memref<64x8xf32, #tpu.memory_space<vmem>>, vector<64x8xf32>
    %cst_43 = arith.constant dense<0.000000e+00> : vector<8x8xf32>
    %197 = tpu.matmul %195, %196, %cst_43 {dimension_numbers = #tpu.dot_dimension_numbers<[1], [0], [0], [1], [0, 0, 1, 1], [], []>} : vector<8x64xf32>, vector<64x8xf32>, vector<8x8xf32> -> vector<8x8xf32>
    %c0_44 = arith.constant 0 : index
    %c0_45 = arith.constant 0 : index
    %198 = vector.load %arg5[%c0_44, %c0_45] : memref<1x8xf32, #tpu.memory_space<vmem>>, vector<1x8xf32>
    %199 = vector.broadcast %198 : vector<1x8xf32> to vector<8x8xf32>
    %200 = arith.addf %197, %199 : vector<8x8xf32>
    %201 = tpu.transpose %200, [1, 0] : vector<8x8xf32> -> vector<8x8xf32>
    %202 = tpu.iota {dimensions = array<i32: 1>} : vector<1x8xi32>
    %203 = tpu.iota {dimensions = array<i32: 0>} : vector<8x1xi32>
    %204 = tpu.iota {dimensions = array<i32: 1>} : vector<8x8xi32>
    %205 = tpu.iota {dimensions = array<i32: 0>} : vector<8x8xi32>
    %c0_46 = arith.constant 0 : index
    %c0_47 = arith.constant 0 : index
    %206 = vector.load %arg6[%c0_46, %c0_47] : memref<8x8xf32, #tpu.memory_space<vmem>>, vector<8x8xf32>
    %c0_48 = arith.constant 0 : index
    %c0_49 = arith.constant 0 : index
    %207 = vector.load %arg7[%c0_48, %c0_49] : memref<8x8xf32, #tpu.memory_space<vmem>>, vector<8x8xf32>
    %c6_i32 = arith.constant 6 : i32
    %208 = vector.broadcast %c6_i32 : i32 to vector<1x8xi32>
    %209 = arith.cmpi eq, %202, %208 : vector<1x8xi32>
    %cst_50 = arith.constant 0.000000e+00 : f32
    %cst_51 = arith.constant -1.000000e+04 : f32
    %210 = vector.broadcast %cst_50 : f32 to vector<1x8xf32>
    %211 = vector.broadcast %cst_51 : f32 to vector<1x8xf32>
    %212 = arith.select %209, %210, %211 : vector<1x8xi1>, vector<1x8xf32>
    %213 = vector.broadcast %212 : vector<1x8xf32> to vector<8x8xf32>
    %214 = arith.addf %207, %213 : vector<8x8xf32>
    %cst_52 = arith.constant dense<0xFF800000> : vector<8xf32>
    %215 = vector.multi_reduction <maximumf>, %214, %cst_52 [1] : vector<8x8xf32> to vector<8xf32>
    %216 = vector.shape_cast %215 : vector<8xf32> to vector<8x1xf32>
    %217 = vector.broadcast %216 : vector<8x1xf32> to vector<8x8xf32>
    %218 = arith.cmpf oeq, %214, %217 : vector<8x8xf32>
    %c8_i32 = arith.constant 8 : i32
    %219 = vector.broadcast %c8_i32 : i32 to vector<8x8xi32>
    %220 = arith.select %218, %204, %219 : vector<8x8xi1>, vector<8x8xi32>
    %cst_53 = arith.constant dense<2147483647> : vector<8xi32>
    %221 = vector.multi_reduction <minsi>, %220, %cst_53 [1] : vector<8x8xi32> to vector<8xi32>
    %222 = vector.shape_cast %221 : vector<8xi32> to vector<8x1xi32>
    %223 = vector.extract_strided_slice %201 {offsets = [0, 0], sizes = [8, 1], strides = [1, 1]} : vector<8x8xf32> to vector<8x1xf32>
    %224 = arith.addf %216, %223 : vector<8x1xf32>
    %225 = vector.broadcast %224 : vector<8x1xf32> to vector<8x8xf32>
    %226 = arith.addf %206, %225 : vector<8x8xf32>
    %cst_54 = arith.constant dense<0xFF800000> : vector<8xf32>
    %227 = vector.multi_reduction <maximumf>, %226, %cst_54 [0] : vector<8x8xf32> to vector<8xf32>
    %228 = vector.shape_cast %227 : vector<8xf32> to vector<1x8xf32>
    %229 = vector.broadcast %228 : vector<1x8xf32> to vector<8x8xf32>
    %230 = arith.cmpf oeq, %226, %229 : vector<8x8xf32>
    %c8_i32_55 = arith.constant 8 : i32
    %231 = vector.broadcast %c8_i32_55 : i32 to vector<8x8xi32>
    %232 = arith.select %230, %205, %231 : vector<8x8xi1>, vector<8x8xi32>
    %cst_56 = arith.constant dense<2147483647> : vector<8xi32>
    %233 = vector.multi_reduction <minsi>, %232, %cst_56 [0] : vector<8x8xi32> to vector<8xi32>
    %234 = vector.shape_cast %233 : vector<8xi32> to vector<1x8xi32>
    %235 = vector.extract_strided_slice %200 {offsets = [1, 0], sizes = [1, 8], strides = [1, 1]} : vector<8x8xf32> to vector<1x8xf32>
    %236 = arith.addf %228, %235 : vector<1x8xf32>
    %237 = vector.broadcast %236 : vector<1x8xf32> to vector<8x8xf32>
    %238 = arith.addf %207, %237 : vector<8x8xf32>
    %cst_57 = arith.constant dense<0xFF800000> : vector<8xf32>
    %239 = vector.multi_reduction <maximumf>, %238, %cst_57 [1] : vector<8x8xf32> to vector<8xf32>
    %240 = vector.shape_cast %239 : vector<8xf32> to vector<8x1xf32>
    %241 = vector.broadcast %240 : vector<8x1xf32> to vector<8x8xf32>
    %242 = arith.cmpf oeq, %238, %241 : vector<8x8xf32>
    %c8_i32_58 = arith.constant 8 : i32
    %243 = vector.broadcast %c8_i32_58 : i32 to vector<8x8xi32>
    %244 = arith.select %242, %204, %243 : vector<8x8xi1>, vector<8x8xi32>
    %cst_59 = arith.constant dense<2147483647> : vector<8xi32>
    %245 = vector.multi_reduction <minsi>, %244, %cst_59 [1] : vector<8x8xi32> to vector<8xi32>
    %246 = vector.shape_cast %245 : vector<8xi32> to vector<8x1xi32>
    %247 = vector.extract_strided_slice %201 {offsets = [0, 2], sizes = [8, 1], strides = [1, 1]} : vector<8x8xf32> to vector<8x1xf32>
    %248 = arith.addf %240, %247 : vector<8x1xf32>
    %249 = vector.broadcast %248 : vector<8x1xf32> to vector<8x8xf32>
    %250 = arith.addf %206, %249 : vector<8x8xf32>
    %cst_60 = arith.constant dense<0xFF800000> : vector<8xf32>
    %251 = vector.multi_reduction <maximumf>, %250, %cst_60 [0] : vector<8x8xf32> to vector<8xf32>
    %252 = vector.shape_cast %251 : vector<8xf32> to vector<1x8xf32>
    %253 = vector.broadcast %252 : vector<1x8xf32> to vector<8x8xf32>
    %254 = arith.cmpf oeq, %250, %253 : vector<8x8xf32>
    %c8_i32_61 = arith.constant 8 : i32
    %255 = vector.broadcast %c8_i32_61 : i32 to vector<8x8xi32>
    %256 = arith.select %254, %205, %255 : vector<8x8xi1>, vector<8x8xi32>
    %cst_62 = arith.constant dense<2147483647> : vector<8xi32>
    %257 = vector.multi_reduction <minsi>, %256, %cst_62 [0] : vector<8x8xi32> to vector<8xi32>
    %258 = vector.shape_cast %257 : vector<8xi32> to vector<1x8xi32>
    %259 = vector.extract_strided_slice %200 {offsets = [3, 0], sizes = [1, 8], strides = [1, 1]} : vector<8x8xf32> to vector<1x8xf32>
    %260 = arith.addf %252, %259 : vector<1x8xf32>
    %261 = vector.broadcast %260 : vector<1x8xf32> to vector<8x8xf32>
    %262 = arith.addf %207, %261 : vector<8x8xf32>
    %cst_63 = arith.constant dense<0xFF800000> : vector<8xf32>
    %263 = vector.multi_reduction <maximumf>, %262, %cst_63 [1] : vector<8x8xf32> to vector<8xf32>
    %264 = vector.shape_cast %263 : vector<8xf32> to vector<8x1xf32>
    %265 = vector.broadcast %264 : vector<8x1xf32> to vector<8x8xf32>
    %266 = arith.cmpf oeq, %262, %265 : vector<8x8xf32>
    %c8_i32_64 = arith.constant 8 : i32
    %267 = vector.broadcast %c8_i32_64 : i32 to vector<8x8xi32>
    %268 = arith.select %266, %204, %267 : vector<8x8xi1>, vector<8x8xi32>
    %cst_65 = arith.constant dense<2147483647> : vector<8xi32>
    %269 = vector.multi_reduction <minsi>, %268, %cst_65 [1] : vector<8x8xi32> to vector<8xi32>
    %270 = vector.shape_cast %269 : vector<8xi32> to vector<8x1xi32>
    %271 = vector.extract_strided_slice %201 {offsets = [0, 4], sizes = [8, 1], strides = [1, 1]} : vector<8x8xf32> to vector<8x1xf32>
    %272 = arith.addf %264, %271 : vector<8x1xf32>
    %273 = vector.broadcast %272 : vector<8x1xf32> to vector<8x8xf32>
    %274 = arith.addf %206, %273 : vector<8x8xf32>
    %cst_66 = arith.constant dense<0xFF800000> : vector<8xf32>
    %275 = vector.multi_reduction <maximumf>, %274, %cst_66 [0] : vector<8x8xf32> to vector<8xf32>
    %276 = vector.shape_cast %275 : vector<8xf32> to vector<1x8xf32>
    %277 = vector.broadcast %276 : vector<1x8xf32> to vector<8x8xf32>
    %278 = arith.cmpf oeq, %274, %277 : vector<8x8xf32>
    %c8_i32_67 = arith.constant 8 : i32
    %279 = vector.broadcast %c8_i32_67 : i32 to vector<8x8xi32>
    %280 = arith.select %278, %205, %279 : vector<8x8xi1>, vector<8x8xi32>
    %cst_68 = arith.constant dense<2147483647> : vector<8xi32>
    %281 = vector.multi_reduction <minsi>, %280, %cst_68 [0] : vector<8x8xi32> to vector<8xi32>
    %282 = vector.shape_cast %281 : vector<8xi32> to vector<1x8xi32>
    %283 = vector.extract_strided_slice %200 {offsets = [5, 0], sizes = [1, 8], strides = [1, 1]} : vector<8x8xf32> to vector<1x8xf32>
    %284 = arith.addf %276, %283 : vector<1x8xf32>
    %285 = vector.broadcast %284 : vector<1x8xf32> to vector<8x8xf32>
    %286 = arith.addf %207, %285 : vector<8x8xf32>
    %cst_69 = arith.constant dense<0xFF800000> : vector<8xf32>
    %287 = vector.multi_reduction <maximumf>, %286, %cst_69 [1] : vector<8x8xf32> to vector<8xf32>
    %288 = vector.shape_cast %287 : vector<8xf32> to vector<8x1xf32>
    %289 = vector.broadcast %288 : vector<8x1xf32> to vector<8x8xf32>
    %290 = arith.cmpf oeq, %286, %289 : vector<8x8xf32>
    %c8_i32_70 = arith.constant 8 : i32
    %291 = vector.broadcast %c8_i32_70 : i32 to vector<8x8xi32>
    %292 = arith.select %290, %204, %291 : vector<8x8xi1>, vector<8x8xi32>
    %cst_71 = arith.constant dense<2147483647> : vector<8xi32>
    %293 = vector.multi_reduction <minsi>, %292, %cst_71 [1] : vector<8x8xi32> to vector<8xi32>
    %294 = vector.shape_cast %293 : vector<8xi32> to vector<8x1xi32>
    %295 = vector.extract_strided_slice %201 {offsets = [0, 6], sizes = [8, 1], strides = [1, 1]} : vector<8x8xf32> to vector<8x1xf32>
    %296 = arith.addf %288, %295 : vector<8x1xf32>
    %297 = vector.broadcast %296 : vector<8x1xf32> to vector<8x8xf32>
    %298 = arith.addf %206, %297 : vector<8x8xf32>
    %cst_72 = arith.constant dense<0xFF800000> : vector<8xf32>
    %299 = vector.multi_reduction <maximumf>, %298, %cst_72 [0] : vector<8x8xf32> to vector<8xf32>
    %300 = vector.shape_cast %299 : vector<8xf32> to vector<1x8xf32>
    %301 = vector.broadcast %300 : vector<1x8xf32> to vector<8x8xf32>
    %302 = arith.cmpf oeq, %298, %301 : vector<8x8xf32>
    %c8_i32_73 = arith.constant 8 : i32
    %303 = vector.broadcast %c8_i32_73 : i32 to vector<8x8xi32>
    %304 = arith.select %302, %205, %303 : vector<8x8xi1>, vector<8x8xi32>
    %cst_74 = arith.constant dense<2147483647> : vector<8xi32>
    %305 = vector.multi_reduction <minsi>, %304, %cst_74 [0] : vector<8x8xi32> to vector<8xi32>
    %306 = vector.shape_cast %305 : vector<8xi32> to vector<1x8xi32>
    %307 = vector.extract_strided_slice %200 {offsets = [7, 0], sizes = [1, 8], strides = [1, 1]} : vector<8x8xf32> to vector<1x8xf32>
    %308 = arith.addf %300, %307 : vector<1x8xf32>
    %309 = vector.extract_strided_slice %207 {offsets = [7, 0], sizes = [1, 8], strides = [1, 1]} : vector<8x8xf32> to vector<1x8xf32>
    %310 = arith.addf %308, %309 : vector<1x8xf32>
    %cst_75 = arith.constant dense<0xFF800000> : vector<1xf32>
    %311 = vector.multi_reduction <maximumf>, %310, %cst_75 [1] : vector<1x8xf32> to vector<1xf32>
    %312 = vector.shape_cast %311 : vector<1xf32> to vector<1x1xf32>
    %313 = vector.broadcast %312 : vector<1x1xf32> to vector<1x8xf32>
    %314 = arith.cmpf oeq, %310, %313 : vector<1x8xf32>
    %c8_i32_76 = arith.constant 8 : i32
    %315 = vector.broadcast %c8_i32_76 : i32 to vector<1x8xi32>
    %316 = arith.select %314, %202, %315 : vector<1x8xi1>, vector<1x8xi32>
    %cst_77 = arith.constant dense<2147483647> : vector<1xi32>
    %317 = vector.multi_reduction <minsi>, %316, %cst_77 [1] : vector<1x8xi32> to vector<1xi32>
    %318 = vector.shape_cast %317 : vector<1xi32> to vector<1x1xi32>
    %c0_78 = arith.constant 0 : index
    %c0_79 = arith.constant 0 : index
    %319 = vector.load %arg8[%c0_78, %c0_79] : memref<1x1xf32, #tpu.memory_space<vmem>>, vector<1x1xf32>
    tpu.vector_store %arg8[%c0_78, %c0_79], %312 {strides = array<i32>} : memref<1x1xf32, #tpu.memory_space<vmem>>, vector<1x1xf32>,
    %320 = tpu.iota {dimensions = array<i32: 1>} : vector<1x8xi32>
    %c7_i32 = arith.constant 7 : i32
    %321 = vector.broadcast %c7_i32 : i32 to vector<1x8xi32>
    %322 = arith.cmpi eq, %320, %321 : vector<1x8xi32>
    %c0_i32 = arith.constant 0 : i32
    %323 = vector.shape_cast %318 : vector<1x1xi32> to vector<1x1xi32>
    %324 = vector.broadcast %323 : vector<1x1xi32> to vector<1x8xi32>
    %325 = vector.broadcast %c0_i32 : i32 to vector<1x8xi32>
    %326 = arith.select %322, %324, %325 : vector<1x8xi1>, vector<1x8xi32>
    %327 = vector.broadcast %318 : vector<1x1xi32> to vector<1x8xi32>
    %328 = arith.cmpi eq, %202, %327 : vector<1x8xi32>
    %c0_i32_80 = arith.constant 0 : i32
    %329 = vector.broadcast %c0_i32_80 : i32 to vector<1x8xi32>
    %330 = arith.select %328, %306, %329 : vector<1x8xi1>, vector<1x8xi32>
    %cst_81 = arith.constant dense<0> : vector<1xi32>
    %331 = vector.multi_reduction <add>, %330, %cst_81 [1] : vector<1x8xi32> to vector<1xi32>
    %332 = vector.shape_cast %331 : vector<1xi32> to vector<1x1xi32>
    %c6_i32_82 = arith.constant 6 : i32
    %333 = vector.broadcast %c6_i32_82 : i32 to vector<1x8xi32>
    %334 = arith.cmpi eq, %320, %333 : vector<1x8xi32>
    %335 = vector.shape_cast %332 : vector<1x1xi32> to vector<1x1xi32>
    %336 = vector.broadcast %335 : vector<1x1xi32> to vector<1x8xi32>
    %337 = arith.select %334, %336, %326 : vector<1x8xi1>, vector<1x8xi32>
    %338 = vector.broadcast %332 : vector<1x1xi32> to vector<8x1xi32>
    %339 = arith.cmpi eq, %203, %338 : vector<8x1xi32>
    %c0_i32_83 = arith.constant 0 : i32
    %340 = vector.broadcast %c0_i32_83 : i32 to vector<8x1xi32>
    %341 = arith.select %339, %294, %340 : vector<8x1xi1>, vector<8x1xi32>
    %cst_84 = arith.constant dense<0> : vector<1xi32>
    %342 = vector.multi_reduction <add>, %341, %cst_84 [0] : vector<8x1xi32> to vector<1xi32>
    %343 = vector.shape_cast %342 : vector<1xi32> to vector<1x1xi32>
    %c5_i32 = arith.constant 5 : i32
    %344 = vector.broadcast %c5_i32 : i32 to vector<1x8xi32>
    %345 = arith.cmpi eq, %320, %344 : vector<1x8xi32>
    %346 = vector.shape_cast %343 : vector<1x1xi32> to vector<1x1xi32>
    %347 = vector.broadcast %346 : vector<1x1xi32> to vector<1x8xi32>
    %348 = arith.select %345, %347, %337 : vector<1x8xi1>, vector<1x8xi32>
    %349 = vector.broadcast %343 : vector<1x1xi32> to vector<1x8xi32>
    %350 = arith.cmpi eq, %202, %349 : vector<1x8xi32>
    %c0_i32_85 = arith.constant 0 : i32
    %351 = vector.broadcast %c0_i32_85 : i32 to vector<1x8xi32>
    %352 = arith.select %350, %282, %351 : vector<1x8xi1>, vector<1x8xi32>
    %cst_86 = arith.constant dense<0> : vector<1xi32>
    %353 = vector.multi_reduction <add>, %352, %cst_86 [1] : vector<1x8xi32> to vector<1xi32>
    %354 = vector.shape_cast %353 : vector<1xi32> to vector<1x1xi32>
    %c4_i32 = arith.constant 4 : i32
    %355 = vector.broadcast %c4_i32 : i32 to vector<1x8xi32>
    %356 = arith.cmpi eq, %320, %355 : vector<1x8xi32>
    %357 = vector.shape_cast %354 : vector<1x1xi32> to vector<1x1xi32>
    %358 = vector.broadcast %357 : vector<1x1xi32> to vector<1x8xi32>
    %359 = arith.select %356, %358, %348 : vector<1x8xi1>, vector<1x8xi32>
    %360 = vector.broadcast %354 : vector<1x1xi32> to vector<8x1xi32>
    %361 = arith.cmpi eq, %203, %360 : vector<8x1xi32>
    %c0_i32_87 = arith.constant 0 : i32
    %362 = vector.broadcast %c0_i32_87 : i32 to vector<8x1xi32>
    %363 = arith.select %361, %270, %362 : vector<8x1xi1>, vector<8x1xi32>
    %cst_88 = arith.constant dense<0> : vector<1xi32>
    %364 = vector.multi_reduction <add>, %363, %cst_88 [0] : vector<8x1xi32> to vector<1xi32>
    %365 = vector.shape_cast %364 : vector<1xi32> to vector<1x1xi32>
    %c3_i32 = arith.constant 3 : i32
    %366 = vector.broadcast %c3_i32 : i32 to vector<1x8xi32>
    %367 = arith.cmpi eq, %320, %366 : vector<1x8xi32>
    %368 = vector.shape_cast %365 : vector<1x1xi32> to vector<1x1xi32>
    %369 = vector.broadcast %368 : vector<1x1xi32> to vector<1x8xi32>
    %370 = arith.select %367, %369, %359 : vector<1x8xi1>, vector<1x8xi32>
    %371 = vector.broadcast %365 : vector<1x1xi32> to vector<1x8xi32>
    %372 = arith.cmpi eq, %202, %371 : vector<1x8xi32>
    %c0_i32_89 = arith.constant 0 : i32
    %373 = vector.broadcast %c0_i32_89 : i32 to vector<1x8xi32>
    %374 = arith.select %372, %258, %373 : vector<1x8xi1>, vector<1x8xi32>
    %cst_90 = arith.constant dense<0> : vector<1xi32>
    %375 = vector.multi_reduction <add>, %374, %cst_90 [1] : vector<1x8xi32> to vector<1xi32>
    %376 = vector.shape_cast %375 : vector<1xi32> to vector<1x1xi32>
    %c2_i32 = arith.constant 2 : i32
    %377 = vector.broadcast %c2_i32 : i32 to vector<1x8xi32>
    %378 = arith.cmpi eq, %320, %377 : vector<1x8xi32>
    %379 = vector.shape_cast %376 : vector<1x1xi32> to vector<1x1xi32>
    %380 = vector.broadcast %379 : vector<1x1xi32> to vector<1x8xi32>
    %381 = arith.select %378, %380, %370 : vector<1x8xi1>, vector<1x8xi32>
    %382 = vector.broadcast %376 : vector<1x1xi32> to vector<8x1xi32>
    %383 = arith.cmpi eq, %203, %382 : vector<8x1xi32>
    %c0_i32_91 = arith.constant 0 : i32
    %384 = vector.broadcast %c0_i32_91 : i32 to vector<8x1xi32>
    %385 = arith.select %383, %246, %384 : vector<8x1xi1>, vector<8x1xi32>
    %cst_92 = arith.constant dense<0> : vector<1xi32>
    %386 = vector.multi_reduction <add>, %385, %cst_92 [0] : vector<8x1xi32> to vector<1xi32>
    %387 = vector.shape_cast %386 : vector<1xi32> to vector<1x1xi32>
    %c1_i32 = arith.constant 1 : i32
    %388 = vector.broadcast %c1_i32 : i32 to vector<1x8xi32>
    %389 = arith.cmpi eq, %320, %388 : vector<1x8xi32>
    %390 = vector.shape_cast %387 : vector<1x1xi32> to vector<1x1xi32>
    %391 = vector.broadcast %390 : vector<1x1xi32> to vector<1x8xi32>
    %392 = arith.select %389, %391, %381 : vector<1x8xi1>, vector<1x8xi32>
    %393 = vector.broadcast %387 : vector<1x1xi32> to vector<1x8xi32>
    %394 = arith.cmpi eq, %202, %393 : vector<1x8xi32>
    %c0_i32_93 = arith.constant 0 : i32
    %395 = vector.broadcast %c0_i32_93 : i32 to vector<1x8xi32>
    %396 = arith.select %394, %234, %395 : vector<1x8xi1>, vector<1x8xi32>
    %cst_94 = arith.constant dense<0> : vector<1xi32>
    %397 = vector.multi_reduction <add>, %396, %cst_94 [1] : vector<1x8xi32> to vector<1xi32>
    %398 = vector.shape_cast %397 : vector<1xi32> to vector<1x1xi32>
    %c0_i32_95 = arith.constant 0 : i32
    %399 = vector.broadcast %c0_i32_95 : i32 to vector<1x8xi32>
    %400 = arith.cmpi eq, %320, %399 : vector<1x8xi32>
    %401 = vector.shape_cast %398 : vector<1x1xi32> to vector<1x1xi32>
    %402 = vector.broadcast %401 : vector<1x1xi32> to vector<1x8xi32>
    %403 = arith.select %400, %402, %392 : vector<1x8xi1>, vector<1x8xi32>
    %404 = vector.broadcast %398 : vector<1x1xi32> to vector<8x1xi32>
    %405 = arith.cmpi eq, %203, %404 : vector<8x1xi32>
    %c0_i32_96 = arith.constant 0 : i32
    %406 = vector.broadcast %c0_i32_96 : i32 to vector<8x1xi32>
    %407 = arith.select %405, %222, %406 : vector<8x1xi1>, vector<8x1xi32>
    %cst_97 = arith.constant dense<0> : vector<1xi32>
    %408 = vector.multi_reduction <add>, %407, %cst_97 [0] : vector<8x1xi32> to vector<1xi32>
    %409 = vector.shape_cast %408 : vector<1xi32> to vector<1x1xi32>
    %c0_98 = arith.constant 0 : index
    %c0_99 = arith.constant 0 : index
    %410 = vector.load %arg9[%c0_98, %c0_99] : memref<1x8xi32, #tpu.memory_space<vmem>>, vector<1x8xi32>
    tpu.vector_store %arg9[%c0_98, %c0_99], %403 {strides = array<i32>} : memref<1x8xi32, #tpu.memory_space<vmem>>, vector<1x8xi32>,
    %c0_100 = arith.constant 0 : index
    %c0_101 = arith.constant 0 : index
    %411 = vector.load %arg10[%c0_100, %c0_101] : memref<1x1xi32, #tpu.memory_space<vmem>>, vector<1x1xi32>
    tpu.vector_store %arg10[%c0_100, %c0_101], %409 {strides = array<i32>} : memref<1x1xi32, #tpu.memory_space<vmem>>, vector<1x1xi32>,
    return
  }
}

</mosaic_0001>

<bundles_post_ra>
// kernel: _crf2_device.1
= control target key start
LH: loop header
LB: loop body
LE: loop exit
PB: predicated region body
PF: predicated region fallthrough
CT: control target
= control target key end

     0   :  { %16 = vsyncpa [#allocation3], 0  ;;  %s2307_s0 = inlined_call_operand.vmem [shape: f32[8,64], index: 0, kind: input, shape index: {}]   ;;  %s2308_s1 = inlined_call_operand.vmem [shape: f32[64,256], index: 1, kind: input, shape index: {}]   ;;  %s2309_s2 = inlined_call_operand.hbm [shape: f32[64,256], index: 2, kind: input, shape index: {}]   ;;  %s2310_s3 = inlined_call_operand.vmem [shape: f32[1,256], index: 3, kind: input, shape index: {}]   ;;  %s2311_s4 = inlined_call_operand.vmem [shape: f32[64,8], index: 4, kind: input, shape index: {}]   ;;  %s2312_s5 = inlined_call_operand.vmem [shape: f32[1,8], index: 5, kind: input, shape index: {}]   ;;  %s2313_s6 = inlined_call_operand.vmem [shape: f32[8,8], index: 6, kind: input, shape index: {}]   ;;  %s2314_s7 = inlined_call_operand.vmem [shape: f32[8,8], index: 7, kind: input, shape index: {}]   ;;  %s2315_s8 = inlined_call_operand.hbm [shape: f32[1,1], index: 8, kind: output, shape index: {0}]   ;;  %s2316_s9 = inlined_call_operand.hbm [shape: s32[1,8], index: 9, kind: output, shape index: {1}]   ;;  %s2317_s10 = inlined_call_operand.hbm [shape: s32[1,1], index: 10, kind: output, shape index: {2}]  }
   0x1   :  { %17 = vsyncpa [#allocation4], 0 }
   0x2   :  { %18 = vsyncpa [#allocation7], 0  ;;  %s27_s15 = sshll.u32 %s2309_s2, 4  ;;  %s1712_s16 = smov [#allocation2]   ;;  %s28_s15 = int_to_ptr.hbm [resolvable:$true] %s27_s15 }
   0x3   :  { %s29_s17 = sshll.u32 %s1712_s16, 4  ;;  %s1713_s18 = smov 256   ;;  %s30_s17 = int_to_ptr.vmem [resolvable:$true] %s29_s17 }
   0x4   :  { %s1714_s19 = smov 16  }
   0x5   :  { %35 = dma.hbm_to_vmem [thread:$0]  %s28_s15, 2048, %s30_s17, [#allocation3], %s1713_s18, %s1713_s18, %s1714_s19  }
   0x6   :  { %1706 = dma.done.wait [#allocation3], 2048  }
   0x7   :  { %1707 = vsyncadd [#allocation3], 4294965248  ;;  %v1783_v0 = vld [vmem:[#allocation2 + $0x70] sm:$0xff]  ;;  %v1785_v1 = vld [vmem:[#allocation2 + $0x78] sm:$0xff]  ;;  %vm73_vm0 = vcmask 523264   ;;  %v1715_v33 = vmov 0.0  }
   0x8   :  { %v1787_v2 = vld [vmem:[#allocation2 + $0x60] sm:$0xff]  ;;  %144 = vmatpush.msra.mxu2 %v1783_v0  ;;  %164 = vmatpush.msra.mxu3 %v1785_v1  ;;  %v1791_v3 = vld [vmem:[#allocation2 + $0x68] sm:$0xff]  ;;  %v65_v4 = vld [vmem:[%s2308_s1 + $0x70] sm:$0xff]  ;;  %s1429_s11 = sshll.u32 %s2315_s8, 4  ;;  %s1440_s15 = sshll.u32 %s2316_s9, 4  ;;  %s1430_s11 = int_to_ptr.hbm [resolvable:$true] %s1429_s11  ;;  %s1441_s15 = int_to_ptr.hbm [resolvable:$true] %s1440_s15 }
   0x9   :  { %v66_v5 = vld [vmem:[%s2308_s1 + $0x78] sm:$0xff]  ;;  %85 = vmatpush.msra.mxu0 %v65_v4  ;;  %v1799_v6 = vld [vmem:[#allocation2 + $0x50] sm:$0xff]  ;;  %v63_v8 = vld [vmem:[%s2308_s1 + $0x60] sm:$0xff]  ;;  %s1724_s8 = smov [#allocation8]   ;;  %s1451_s18 = sshll.u32 %s2317_s10, 4  ;;  %s1452_s18 = int_to_ptr.hbm [resolvable:$true] %s1451_s18 }
   0xa   :  { %105 = vmatpush.msra.mxu1 %v66_v5  ;;  %v1801_v7 = vld [vmem:[#allocation2 + $0x58] sm:$0xff]  ;;  %145 = vmatpush.msra.mxu2 %v1787_v2  ;;  %v64_v9 = vld [vmem:[%s2308_s1 + $0x68] sm:$0xff]  ;;  %v1811_v10 = vld [vmem:[#allocation2 + $0x40] sm:$0xff]  ;;  %s1449_s9 = sshll.u32 %s1724_s8, 4  ;;  %s1450_s9 = int_to_ptr.vmem [resolvable:$true] %s1449_s9 }
   0xb   :  { %165 = vmatpush.msra.mxu3 %v1791_v3  ;;  %86 = vmatpush.msra.mxu0 %v63_v8  ;;  %v1813_v11 = vld [vmem:[#allocation2 + $0x48] sm:$0xff]  ;;  %v61_v12 = vld [vmem:[%s2308_s1 + $0x50] sm:$0xff]  ;;  %v62_v13 = vld [vmem:[%s2308_s1 + $0x58] sm:$0xff] }
   0xc   :  { %106 = vmatpush.msra.mxu1 %v64_v9  ;;  %146 = vmatpush.msra.mxu2 %v1799_v6  ;;  %v59_v14 = vld [vmem:[%s2308_s1 + $0x40] sm:$0xff]  ;;  %v60_v15 = vld [vmem:[%s2308_s1 + $0x48] sm:$0xff]  ;;  %v1829_v16 = vld [vmem:[#allocation2 + $0x30] sm:$0xff] }
   0xd   :  { %166 = vmatpush.msra.mxu3 %v1801_v7  ;;  %87 = vmatpush.msra.mxu0 %v61_v12  ;;  %v1831_v17 = vld [vmem:[#allocation2 + $0x38] sm:$0xff]  ;;  %v57_v18 = vld [vmem:[%s2308_s1 + $0x30] sm:$0xff]  ;;  %v1841_v20 = vld [vmem:[#allocation2 + $0x20] sm:$0xff] }
   0xe   :  { %107 = vmatpush.msra.mxu1 %v62_v13  ;;  %147 = vmatpush.msra.mxu2 %v1811_v10  ;;  %v58_v19 = vld [vmem:[%s2308_s1 + $0x38] sm:$0xff]  ;;  %v1843_v21 = vld [vmem:[#allocation2 + $0x28] sm:$0xff]  ;;  %v55_v22 = vld [vmem:[%s2308_s1 + $0x20] sm:$0xff] }
   0xf   :  { %167 = vmatpush.msra.mxu3 %v1813_v11  ;;  %88 = vmatpush.msra.mxu0 %v59_v14  ;;  %v56_v23 = vld [vmem:[%s2308_s1 + $0x28] sm:$0xff]  ;;  %v1853_v24 = vld [vmem:[#allocation2 + $0x10] sm:$0xff]  ;;  %v1855_v25 = vld [vmem:[#allocation2 + $0x18] sm:$0xff] }
  0x10   :  { %108 = vmatpush.msra.mxu1 %v60_v15  ;;  %148 = vmatpush.msra.mxu2 %v1829_v16  ;;  %v53_v26 = vld [vmem:[%s2308_s1 + $0x10] sm:$0xff]  ;;  %v54_v27 = vld [vmem:[%s2308_s1 + $0x18] sm:$0xff]  ;;  %v1865_v28 = vld [vmem:[#allocation2] sm:$0xff] }
  0x11   :  { %168 = vmatpush.msra.mxu3 %v1831_v17  ;;  %89 = vmatpush.msra.mxu0 %v57_v18  ;;  %v1867_v29 = vld [vmem:[#allocation2 + $0x8] sm:$0xff]  ;;  %v51_v30 = vld [vmem:[%s2308_s1] sm:$0xff] }
  0x12   :  { %109 = vmatpush.msra.mxu1 %v58_v19  ;;  %149 = vmatpush.msra.mxu2 %v1841_v20  ;;  %v52_v31 = vld [vmem:[%s2308_s1 + $0x8] sm:$0xff]  ;;  %v50_v32 = vld [vmem:[%s2307_s0] sm:$0xff]  ;;  %s1722_s0 = smov [#allocation5]  }
  0x13   :  { %169 = vmatpush.msra.mxu3 %v1843_v21  ;;  %90 = vmatpush.msra.mxu0 %v55_v22  ;;  %v67_v34 = vld [vmem:[%s2310_s3] sm:$0x3]  ;;  %s1716_s3 = smov 64   ;;  %s1427_s1 = sshll.u32 %s1722_s0, 4  ;;  %s1428_s1 = int_to_ptr.vmem [resolvable:$true] %s1427_s1 }
  0x14   :  { %110 = vmatpush.msra.mxu1 %v56_v23  ;;  %150 = vmatpush.msra.mxu2 %v1853_v24  ;;  %v69_v35 = vperm.slane %v67_v34, 0  ;;  %v70_v36 = vperm.slane %v67_v34, 1 }
  0x15   :  { %170 = vmatpush.msra.mxu3 %v1855_v25  ;;  %91 = vmatpush.msra.mxu0 %v53_v26 }
  0x16   :  { %111 = vmatpush.msra.mxu1 %v54_v27  ;;  %151 = vmatpush.msra.mxu2 %v1865_v28 }
  0x17   :  { %171 = vmatpush.msra.mxu3 %v1867_v29  ;;  %152 = vmatmul.f32.vlgmr.msra.gmra.mxu2 %v1715_v33 }
  0x18   :  { %172 = vmatmul.f32.vlgmr.msra.gmra.mxu3 %v1715_v33  ;;  %92 = vmatpush.msra.mxu0 %v51_v30 }
  0x19   :  { %112 = vmatpush.msra.mxu1 %v52_v31  ;;  %1470 = vmatmul.msk.f32.vlgmr.msra.gmra.mxu0 %vm73_vm0, %v50_v32 }
  0x1a   :  { %1471 = vmatmul.msk.f32.vlgmr.msra.gmra.mxu1 %vm73_vm0, %v50_v32  ;;  %240 = vmatpush.msrb.mxu0 %v1783_v0 }
  0x1b   :  { %260 = vmatpush.msrb.mxu1 %v1785_v1  ;;  %346 = vmatpush.msrb.mxu2 %v1783_v0 }
  0x1c   :  { %366 = vmatpush.msrb.mxu3 %v1785_v1  ;;  %241 = vmatpush.msrb.mxu0 %v1787_v2 }
  0x1d   :  { %261 = vmatpush.msrb.mxu1 %v1791_v3  ;;  %347 = vmatpush.msrb.mxu2 %v1787_v2 }
  0x1e   :  { %367 = vmatpush.msrb.mxu3 %v1791_v3  ;;  %242 = vmatpush.msrb.mxu0 %v1799_v6 }
  0x1f   :  { %262 = vmatpush.msrb.mxu1 %v1801_v7  ;;  %348 = vmatpush.msrb.mxu2 %v1799_v6 }
  0x20   :  { %368 = vmatpush.msrb.mxu3 %v1801_v7  ;;  %243 = vmatpush.msrb.mxu0 %v1811_v10 }
  0x21   :  { %263 = vmatpush.msrb.mxu1 %v1813_v11  ;;  %349 = vmatpush.msrb.mxu2 %v1811_v10 }
  0x22   :  { %369 = vmatpush.msrb.mxu3 %v1813_v11  ;;  %244 = vmatpush.msrb.mxu0 %v1829_v16 }
  0x23   :  { %264 = vmatpush.msrb.mxu1 %v1831_v17  ;;  %350 = vmatpush.msrb.mxu2 %v1829_v16 }
  0x24   :  { %370 = vmatpush.msrb.mxu3 %v1831_v17  ;;  %245 = vmatpush.msrb.mxu0 %v1841_v20 }
  0x25   :  { %265 = vmatpush.msrb.mxu1 %v1843_v21  ;;  %351 = vmatpush.msrb.mxu2 %v1841_v20 }
  0x26   :  { %371 = vmatpush.msrb.mxu3 %v1843_v21  ;;  %246 = vmatpush.msrb.mxu0 %v1853_v24 }
  0x27   :  { %266 = vmatpush.msrb.mxu1 %v1855_v25  ;;  %352 = vmatpush.msrb.mxu2 %v1853_v24 }
  0x28   :  { %372 = vmatpush.msrb.mxu3 %v1855_v25  ;;  %247 = vmatpush.msrb.mxu0 %v1865_v28 }
  0x29   :  { %267 = vmatpush.msrb.mxu1 %v1867_v29  ;;  %353 = vmatpush.msrb.mxu2 %v1865_v28 }
  0x2a   :  { %373 = vmatpush.msrb.mxu3 %v1867_v29  ;;  %452 = vmatpush.msra.mxu0 %v1783_v0 }
  0x2b   :  { %472 = vmatpush.msra.mxu1 %v1785_v1  ;;  %558 = vmatpush.msra.mxu2 %v1783_v0 }
  0x2c   :  { %578 = vmatpush.msra.mxu3 %v1785_v1  ;;  %453 = vmatpush.msra.mxu0 %v1787_v2 }
  0x2d   :  { %473 = vmatpush.msra.mxu1 %v1791_v3  ;;  %559 = vmatpush.msra.mxu2 %v1787_v2 }
  0x2e   :  { %579 = vmatpush.msra.mxu3 %v1791_v3  ;;  %454 = vmatpush.msra.mxu0 %v1799_v6 }
  0x2f   :  { %474 = vmatpush.msra.mxu1 %v1801_v7  ;;  %560 = vmatpush.msra.mxu2 %v1799_v6 }
  0x30   :  { %580 = vmatpush.msra.mxu3 %v1801_v7  ;;  %455 = vmatpush.msra.mxu0 %v1811_v10 }
  0x31   :  { %475 = vmatpush.msra.mxu1 %v1813_v11  ;;  %561 = vmatpush.msra.mxu2 %v1811_v10 }
  0x32   :  { %581 = vmatpush.msra.mxu3 %v1813_v11  ;;  %456 = vmatpush.msra.mxu0 %v1829_v16 }
  0x33   :  { %476 = vmatpush.msra.mxu1 %v1831_v17  ;;  %562 = vmatpush.msra.mxu2 %v1829_v16 }
  0x34   :  { %582 = vmatpush.msra.mxu3 %v1831_v17  ;;  %457 = vmatpush.msra.mxu0 %v1841_v20 }
  0x35   :  { %477 = vmatpush.msra.mxu1 %v1843_v21  ;;  %563 = vmatpush.msra.mxu2 %v1841_v20 }
  0x36   :  { %583 = vmatpush.msra.mxu3 %v1843_v21  ;;  %458 = vmatpush.msra.mxu0 %v1853_v24 }
  0x37   :  { %478 = vmatpush.msra.mxu1 %v1855_v25  ;;  %564 = vmatpush.msra.mxu2 %v1853_v24 }
  0x38   :  { %584 = vmatpush.msra.mxu3 %v1855_v25  ;;  %459 = vmatpush.msra.mxu0 %v1865_v28 }
  0x39   :  { %479 = vmatpush.msra.mxu1 %v1867_v29  ;;  %565 = vmatpush.msra.mxu2 %v1865_v28 }
  0x3a   :  { %585 = vmatpush.msra.mxu3 %v1867_v29 }
  0x96   :  { %v94_v37 = vpop.f32.mrf.mxu0 }
  0x97   :  { %v114_v38 = vpop.f32.mrf.mxu1  ;;  %v1951_v39 = vadd.f32 %v94_v37, %v69_v35 }
  0x98   :  { %v1953_v40 = vadd.f32 %v114_v38, %v70_v36 }
  0x9a   :  { %v153_v41 = vpop.f32.mrf.mxu2 }
  0x9b   :  { %v173_v42 = vpop.f32.mrf.mxu3  ;;  %v176_v43 = vadd.f32 %v153_v41, %v1951_v39 }
  0x9c   :  { %v177_v44 = vadd.f32 %v173_v42, %v1953_v40 }
  0x9d   :  { %v1472_v45 = vmul.f32 -1.442695, %v176_v43 }
  0x9e   :  { %v1473_v46 = vmul.f32 -1.442695, %v177_v44 }
  0x9f   :  { %1530 = vpow2.f32 %v1472_v45 }
  0xa0   :  { %1532 = vpow2.f32 %v1473_v46 }
  0xa5   :  { %v1531_v47 = vpop.eup %1530 }
  0xa6   :  { %v1533_v48 = vpop.eup %1532  ;;  %v184_v49 = vadd.f32 1.0, %v1531_v47 }
  0xa7   :  { %v185_v50 = vadd.f32 1.0, %v1533_v48 }
  0xa8   :  { %1534 = vrcp.f32 %v184_v49  ;;  %v197_v63 = vand.u32 2147483648, %v184_v49  ;;  %vm191_vm5 = vweird.f32 %v184_v49  ;;  %v195_v5 = vand.u32 2147483647, %v184_v49 }
  0xa9   :  { %1536 = vrcp.f32 %v185_v50  ;;  %v212_v58 = vand.u32 2147483648, %v185_v50  ;;  %v210_v60 = vand.u32 2147483647, %v185_v50  ;;  %vm206_vm3 = vweird.f32 %v185_v50 }
  0xaa   :  { %v198_v14 = vor.u32 1.1754944e-38, %v197_v63  ;;  %vm196_vm8 = vcmp.eq.f32.partialorder %v195_v5, 8.507059e+37 }
  0xab   :  { %v213_v4 = vor.u32 1.1754944e-38, %v212_v58  ;;  %vm211_vm6 = vcmp.eq.f32.partialorder %v210_v60, 8.507059e+37 }
  0xae   :  { %v1535_v51 = vpop.eup %1534 }
  0xaf   :  { %v1537_v52 = vpop.eup %1536  ;;  %v187_v53 = vmul.f32 %v1535_v51, %v184_v49  ;;  %vm192_vm2 = vweird.f32 %v1535_v51 }
  0xb0   :  { %v202_v54 = vmul.f32 %v1537_v52, %v185_v50  ;;  %vm207_vm1 = vweird.f32 %v1537_v52  ;;  %vm193_vm7 = vmor %vm191_vm5, %vm192_vm2 }
  0xb1   :  { %v188_v55 = vsub.f32 1.0, %v187_v53  ;;  %vm208_vm4 = vmor %vm206_vm3, %vm207_vm1 }
  0xb2   :  { %v203_v56 = vsub.f32 1.0, %v202_v54 }
  0xb3   :  { %v189_v57 = vmul.f32 %v1535_v51, %v188_v55 }
  0xb4   :  { %v204_v59 = vmul.f32 %v1537_v52, %v203_v56 }
  0xb5   :  { %v190_v61 = vadd.f32 %v1535_v51, %v189_v57 }
  0xb6   :  { %v205_v62 = vadd.f32 %v1537_v52, %v204_v59 }
  0xb7   :  { %v194_v12 = vsel %vm193_vm7, %v1535_v51, %v190_v61 }
  0xb8   :  { %v209_v8 = vsel %vm208_vm4, %v1537_v52, %v205_v62  ;;  %v199_v18 = vsel %vm196_vm8, %v198_v14, %v194_v12 }
  0xb9   :  { %v214_v9 = vsel %vm211_vm6, %v213_v4, %v209_v8  ;;  %v218_v22 = vmul.f32 0.0, %v199_v18 }
  0xba   :  { %v216_v13 = vmul.f32 2.0, %v214_v9 }
  0xbc   :  { %v1474_v15 = vadd.f32 -1.0, %v216_v13 }
  0xbe   :  { %v219_v19 = vmul.f32 %v1474_v15, %v199_v18 }
  0xc0   :  { %221 = vrot.lane.b32.xlu0 %v219_v19, %s1716_s3 }
 0x132   :  { %v222_v23 = vpop.permute.xlu0 %221 }
 0x133   :  { %v1958_v26 = vadd.f32 %v222_v23, %v218_v22 }
 0x135   :  { %1538 = vtanh.f32 %v1958_v26  ;;  %v321_v61 = vrot.slane %v1958_v26, 7 }
 0x13b   :  { %v1539_v27 = vpop.eup %1538 }
 0x13c   :  { %v1961_v30 = vmul.f32 %v1539_v27, %v214_v9 }
 0x13e   :  { %228 = vrot.lane.b32.xlu0 %v1961_v30, %s1716_s3 }
 0x1b0   :  { %v229_v31 = vpop.permute.xlu0 %228 }
 0x1b1   :  { %1475 = vmatmul.msk.f32.vlgmr.msrb.gmra.mxu0 %vm73_vm0, %v229_v31  ;;  %1476 = vmatmul.msk.f32.vlgmr.msrb.gmra.mxu1 %vm73_vm0, %v229_v31 }
 0x1b2   :  { %664 = vmatpush.msrb.mxu0 %v1783_v0  ;;  %684 = vmatpush.msrb.mxu1 %v1785_v1 }
 0x1b4   :  { %665 = vmatpush.msrb.mxu0 %v1787_v2  ;;  %685 = vmatpush.msrb.mxu1 %v1791_v3 }
 0x1b6   :  { %666 = vmatpush.msrb.mxu0 %v1799_v6  ;;  %686 = vmatpush.msrb.mxu1 %v1801_v7 }
 0x1b8   :  { %667 = vmatpush.msrb.mxu0 %v1811_v10  ;;  %687 = vmatpush.msrb.mxu1 %v1813_v11 }
 0x1ba   :  { %668 = vmatpush.msrb.mxu0 %v1829_v16  ;;  %688 = vmatpush.msrb.mxu1 %v1831_v17 }
 0x1bc   :  { %669 = vmatpush.msrb.mxu0 %v1841_v20  ;;  %689 = vmatpush.msrb.mxu1 %v1843_v21 }
 0x1be   :  { %670 = vmatpush.msrb.mxu0 %v1853_v24  ;;  %690 = vmatpush.msrb.mxu1 %v1855_v25 }
 0x1c0   :  { %671 = vmatpush.msrb.mxu0 %v1865_v28  ;;  %691 = vmatpush.msrb.mxu1 %v1867_v29 }
 0x22e   :  { %v249_v32 = vpop.f32.mrf.mxu0  ;;  %v269_v33 = vpop.f32.mrf.mxu1 }
 0x22f   :  { %v274_v34 = vrot.slane %v249_v32, 7  ;;  %v275_v35 = vrot.slane %v269_v33, 7 }
 0x231   :  { %v278_v36 = vadd.f32 %v274_v34, %v1951_v39  ;;  %v279_v37 = vadd.f32 %v275_v35, %v1953_v40 }
 0x233   :  { %v1477_v38 = vmul.f32 -1.442695, %v278_v36  ;;  %v1478_v41 = vmul.f32 -1.442695, %v279_v37 }
 0x235   :  { %1540 = vpow2.f32 %v1477_v38 }
 0x236   :  { %1542 = vpow2.f32 %v1478_v41 }
 0x23b   :  { %v1541_v42 = vpop.eup %1540 }
 0x23c   :  { %v1543_v43 = vpop.eup %1542  ;;  %v286_v44 = vadd.f32 1.0, %v1541_v42 }
 0x23d   :  { %v287_v45 = vadd.f32 1.0, %v1543_v43 }
 0x23e   :  { %1544 = vrcp.f32 %v286_v44  ;;  %v299_v51 = vand.u32 2147483648, %v286_v44  ;;  %v297_v54 = vand.u32 2147483647, %v286_v44  ;;  %vm293_vm11 = vweird.f32 %v286_v44 }
 0x23f   :  { %1546 = vrcp.f32 %v287_v45  ;;  %v314_v55 = vand.u32 2147483648, %v287_v45  ;;  %v312_v57 = vand.u32 2147483647, %v287_v45  ;;  %vm308_vm13 = vweird.f32 %v287_v45 }
 0x240   :  { %v300_v59 = vor.u32 1.1754944e-38, %v299_v51  ;;  %vm298_vm14 = vcmp.eq.f32.partialorder %v297_v54, 8.507059e+37 }
 0x241   :  { %v315_v63 = vor.u32 1.1754944e-38, %v314_v55  ;;  %vm313_vm1 = vcmp.eq.f32.partialorder %v312_v57, 8.507059e+37 }
 0x244   :  { %v1545_v46 = vpop.eup %1544 }
 0x245   :  { %v1547_v47 = vpop.eup %1546  ;;  %v289_v48 = vmul.f32 %v1545_v46, %v286_v44  ;;  %vm294_vm9 = vweird.f32 %v1545_v46 }
 0x246   :  { %v304_v49 = vmul.f32 %v1547_v47, %v287_v45  ;;  %vm309_vm10 = vweird.f32 %v1547_v47  ;;  %vm295_vm12 = vmor %vm293_vm11, %vm294_vm9  ;;  %vm970_vm11 = vcmask 1041408  }
 0x247   :  { %v290_v50 = vsub.f32 1.0, %v289_v48  ;;  %vm310_vm15 = vmor %vm308_vm13, %vm309_vm10  ;;  %vm968_vm10 = vcmask 1040384  }
 0x248   :  { %v305_v52 = vsub.f32 1.0, %v304_v49 }
 0x249   :  { %v291_v53 = vmul.f32 %v1545_v46, %v290_v50 }
 0x24a   :  { %v306_v56 = vmul.f32 %v1547_v47, %v305_v52 }
 0x24b   :  { %v292_v58 = vadd.f32 %v1545_v46, %v291_v53 }
 0x24c   :  { %v307_v60 = vadd.f32 %v1547_v47, %v306_v56 }
 0x24d   :  { %v296_v62 = vsel %vm295_vm12, %v1545_v46, %v292_v58 }
 0x24e   :  { %v301_v4 = vsel %vm298_vm14, %v300_v59, %v296_v62  ;;  %v311_v5 = vsel %vm310_vm15, %v1547_v47, %v307_v60 }
 0x24f   :  { %v316_v8 = vsel %vm313_vm1, %v315_v63, %v311_v5  ;;  %v323_v9 = vmul.f32 %v321_v61, %v301_v4 }
 0x250   :  { %v318_v12 = vmul.f32 2.0, %v316_v8 }
 0x252   :  { %v1479_v13 = vadd.f32 -1.0, %v318_v12 }
 0x254   :  { %v324_v14 = vmul.f32 %v1479_v13, %v301_v4 }
 0x256   :  { %326 = vrot.lane.b32.xlu1 %v324_v14, %s1716_s3 }
 0x2c8   :  { %v327_v15 = vpop.permute.xlu1 %326 }
 0x2c9   :  { %v1987_v18 = vadd.f32 %v327_v15, %v323_v9 }
 0x2cb   :  { %1548 = vtanh.f32 %v1987_v18  ;;  %v427_v59 = vrot.slane %v1987_v18, 7 }
 0x2d1   :  { %v1549_v19 = vpop.eup %1548 }
 0x2d2   :  { %v1990_v22 = vmul.f32 %v1549_v19, %v316_v8 }
 0x2d4   :  { %v333_v23 = vrot.slane %v1990_v22, 1  ;;  %v969_v19 = vsel %vm968_vm10, %v1961_v30, %v1990_v22 }
 0x2d6   :  { %334 = vrot.lane.b32.xlu1 %v333_v23, %s1716_s3 }
 0x348   :  { %v335_v26 = vpop.permute.xlu1 %334 }
 0x349   :  { %1480 = vmatmul.msk.f32.vlgmr.msrb.gmra.mxu2 %vm73_vm0, %v335_v26  ;;  %1481 = vmatmul.msk.f32.vlgmr.msrb.gmra.mxu3 %vm73_vm0, %v335_v26 }
 0x34a   :  { %770 = vmatpush.msrb.mxu2 %v1783_v0  ;;  %790 = vmatpush.msrb.mxu3 %v1785_v1 }
 0x34c   :  { %771 = vmatpush.msrb.mxu2 %v1787_v2  ;;  %791 = vmatpush.msrb.mxu3 %v1791_v3 }
 0x34e   :  { %772 = vmatpush.msrb.mxu2 %v1799_v6  ;;  %792 = vmatpush.msrb.mxu3 %v1801_v7 }
 0x350   :  { %773 = vmatpush.msrb.mxu2 %v1811_v10  ;;  %793 = vmatpush.msrb.mxu3 %v1813_v11 }
 0x352   :  { %774 = vmatpush.msrb.mxu2 %v1829_v16  ;;  %794 = vmatpush.msrb.mxu3 %v1831_v17 }
 0x354   :  { %775 = vmatpush.msrb.mxu2 %v1841_v20  ;;  %795 = vmatpush.msrb.mxu3 %v1843_v21 }
 0x356   :  { %776 = vmatpush.msrb.mxu2 %v1853_v24  ;;  %796 = vmatpush.msrb.mxu3 %v1855_v25 }
 0x358   :  { %777 = vmatpush.msrb.mxu2 %v1865_v28  ;;  %797 = vmatpush.msrb.mxu3 %v1867_v29 }
 0x3cc   :  { %v355_v27 = vpop.f32.mrf.mxu2  ;;  %v375_v31 = vpop.f32.mrf.mxu3 }
 0x3cd   :  { %v380_v32 = vrot.slane %v355_v27, 6  ;;  %v381_v33 = vrot.slane %v375_v31, 6 }
 0x3cf   :  { %v384_v34 = vadd.f32 %v380_v32, %v1951_v39  ;;  %v385_v35 = vadd.f32 %v381_v33, %v1953_v40 }
 0x3d1   :  { %v1482_v36 = vmul.f32 -1.442695, %v384_v34  ;;  %v1483_v37 = vmul.f32 -1.442695, %v385_v35 }
 0x3d3   :  { %1550 = vpow2.f32 %v1482_v36 }
 0x3d4   :  { %1552 = vpow2.f32 %v1483_v37 }
 0x3d9   :  { %v1551_v38 = vpop.eup %1550 }
 0x3da   :  { %v1553_v41 = vpop.eup %1552  ;;  %v392_v42 = vadd.f32 1.0, %v1551_v38 }
 0x3db   :  { %v393_v43 = vadd.f32 1.0, %v1553_v41 }
 0x3dc   :  { %1554 = vrcp.f32 %v392_v42  ;;  %v405_v49 = vand.u32 2147483648, %v392_v42  ;;  %v403_v52 = vand.u32 2147483647, %v392_v42  ;;  %vm399_vm4 = vweird.f32 %v392_v42 }
 0x3dd   :  { %1556 = vrcp.f32 %v393_v43  ;;  %v420_v53 = vand.u32 2147483648, %v393_v43  ;;  %v418_v55 = vand.u32 2147483647, %v393_v43  ;;  %vm414_vm6 = vweird.f32 %v393_v43 }
 0x3de   :  { %v406_v57 = vor.u32 1.1754944e-38, %v405_v49  ;;  %vm404_vm7 = vcmp.eq.f32.partialorder %v403_v52, 8.507059e+37 }
 0x3df   :  { %v421_v61 = vor.u32 1.1754944e-38, %v420_v53  ;;  %vm419_vm9 = vcmp.eq.f32.partialorder %v418_v55, 8.507059e+37 }
 0x3e2   :  { %v1555_v44 = vpop.eup %1554 }
 0x3e3   :  { %v1557_v45 = vpop.eup %1556  ;;  %v395_v46 = vmul.f32 %v1555_v44, %v392_v42  ;;  %vm400_vm2 = vweird.f32 %v1555_v44 }
 0x3e4   :  { %v410_v47 = vmul.f32 %v1557_v45, %v393_v43  ;;  %vm415_vm3 = vweird.f32 %v1557_v45  ;;  %vm401_vm5 = vmor %vm399_vm4, %vm400_vm2 }
 0x3e5   :  { %v396_v48 = vsub.f32 1.0, %v395_v46  ;;  %vm416_vm8 = vmor %vm414_vm6, %vm415_vm3 }
 0x3e6   :  { %v411_v50 = vsub.f32 1.0, %v410_v47 }
 0x3e7   :  { %v397_v51 = vmul.f32 %v1555_v44, %v396_v48 }
 0x3e8   :  { %v412_v54 = vmul.f32 %v1557_v45, %v411_v50 }
 0x3e9   :  { %v398_v56 = vadd.f32 %v1555_v44, %v397_v51 }
 0x3ea   :  { %v413_v58 = vadd.f32 %v1557_v45, %v412_v54 }
 0x3eb   :  { %v402_v60 = vsel %vm401_vm5, %v1555_v44, %v398_v56  ;;  %vm972_vm5 = vcmask 1042432  }
 0x3ec   :  { %v407_v62 = vsel %vm404_vm7, %v406_v57, %v402_v60  ;;  %v417_v63 = vsel %vm416_vm8, %v1557_v45, %v413_v58 }
 0x3ed   :  { %v422_v4 = vsel %vm419_vm9, %v421_v61, %v417_v63  ;;  %v429_v5 = vmul.f32 %v427_v59, %v407_v62 }
 0x3ee   :  { %v424_v8 = vmul.f32 2.0, %v422_v4 }
 0x3f0   :  { %v1484_v9 = vadd.f32 -1.0, %v424_v8 }
 0x3f2   :  { %v430_v12 = vmul.f32 %v1484_v9, %v407_v62 }
 0x3f4   :  { %432 = vrot.lane.b32.xlu2 %v430_v12, %s1716_s3 }
 0x44e   :  { %v433_v13 = vpop.permute.xlu2 %432 }
 0x44f   :  { %v2016_v14 = vadd.f32 %v433_v13, %v429_v5 }
 0x451   :  { %1558 = vtanh.f32 %v2016_v14  ;;  %v533_v44 = vrot.slane %v2016_v14, 7 }
 0x457   :  { %v1559_v15 = vpop.eup %1558 }
 0x458   :  { %v2019_v18 = vmul.f32 %v1559_v15, %v422_v4 }
 0x45a   :  { %v439_v23 = vrot.slane %v2019_v18, 2  ;;  %v2027_v26 = vsel %vm970_vm11, %v969_v19, %v2019_v18 }
 0x45c   :  { %440 = vrot.lane.b32.xlu2 %v439_v23, %s1716_s3 }
 0x4b6   :  { %v441_v27 = vpop.permute.xlu2 %440 }
 0x4b7   :  { %1485 = vmatmul.msk.f32.vlgmr.msra.gmra.mxu0 %vm73_vm0, %v441_v27  ;;  %1486 = vmatmul.msk.f32.vlgmr.msra.gmra.mxu1 %vm73_vm0, %v441_v27 }
 0x4b8   :  { %876 = vmatpush.msra.mxu0 %v1783_v0  ;;  %896 = vmatpush.msra.mxu1 %v1785_v1 }
 0x4ba   :  { %877 = vmatpush.msra.mxu0 %v1787_v2  ;;  %897 = vmatpush.msra.mxu1 %v1791_v3 }
 0x4bc   :  { %878 = vmatpush.msra.mxu0 %v1799_v6  ;;  %898 = vmatpush.msra.mxu1 %v1801_v7 }
 0x4be   :  { %879 = vmatpush.msra.mxu0 %v1811_v10  ;;  %899 = vmatpush.msra.mxu1 %v1813_v11 }
 0x4c0   :  { %880 = vmatpush.msra.mxu0 %v1829_v16  ;;  %900 = vmatpush.msra.mxu1 %v1831_v17 }
 0x4c2   :  { %881 = vmatpush.msra.mxu0 %v1841_v20  ;;  %901 = vmatpush.msra.mxu1 %v1843_v21 }
 0x4c4   :  { %882 = vmatpush.msra.mxu0 %v1853_v24  ;;  %902 = vmatpush.msra.mxu1 %v1855_v25 }
 0x4c6   :  { %883 = vmatpush.msra.mxu0 %v1865_v28  ;;  %903 = vmatpush.msra.mxu1 %v1867_v29 }
 0x534   :  { %v461_v0 = vpop.f32.mrf.mxu0  ;;  %v481_v1 = vpop.f32.mrf.mxu1 }
 0x535   :  { %v486_v2 = vrot.slane %v461_v0, 5  ;;  %v487_v3 = vrot.slane %v481_v1, 5 }
 0x537   :  { %v490_v6 = vadd.f32 %v486_v2, %v1951_v39  ;;  %v491_v7 = vadd.f32 %v487_v3, %v1953_v40 }
 0x539   :  { %v1487_v10 = vmul.f32 -1.442695, %v490_v6  ;;  %v1488_v11 = vmul.f32 -1.442695, %v491_v7 }
 0x53b   :  { %1560 = vpow2.f32 %v1487_v10 }
 0x53c   :  { %1562 = vpow2.f32 %v1488_v11 }
 0x541   :  { %v1561_v16 = vpop.eup %1560 }
 0x542   :  { %v1563_v17 = vpop.eup %1562  ;;  %v498_v20 = vadd.f32 1.0, %v1561_v16 }
 0x543   :  { %v499_v21 = vadd.f32 1.0, %v1563_v17 }
 0x544   :  { %1564 = vrcp.f32 %v498_v20  ;;  %v511_v32 = vand.u32 2147483648, %v498_v20  ;;  %v509_v35 = vand.u32 2147483647, %v498_v20  ;;  %vm505_vm14 = vweird.f32 %v498_v20 }
 0x545   :  { %1566 = vrcp.f32 %v499_v21  ;;  %v526_v36 = vand.u32 2147483648, %v499_v21  ;;  %v524_v38 = vand.u32 2147483647, %v499_v21  ;;  %vm520_vm1 = vweird.f32 %v499_v21 }
 0x546   :  { %v512_v42 = vor.u32 1.1754944e-38, %v511_v32  ;;  %vm510_vm2 = vcmp.eq.f32.partialorder %v509_v35, 8.507059e+37 }
 0x547   :  { %v527_v46 = vor.u32 1.1754944e-38, %v526_v36  ;;  %vm525_vm4 = vcmp.eq.f32.partialorder %v524_v38, 8.507059e+37 }
 0x54a   :  { %v1565_v24 = vpop.eup %1564 }
 0x54b   :  { %v1567_v25 = vpop.eup %1566  ;;  %v501_v28 = vmul.f32 %v1565_v24, %v498_v20  ;;  %vm506_vm12 = vweird.f32 %v1565_v24 }
 0x54c   :  { %v516_v29 = vmul.f32 %v1567_v25, %v499_v21  ;;  %vm521_vm13 = vweird.f32 %v1567_v25  ;;  %vm507_vm15 = vmor %vm505_vm14, %vm506_vm12 }
 0x54d   :  { %v502_v31 = vsub.f32 1.0, %v501_v28  ;;  %vm522_vm3 = vmor %vm520_vm1, %vm521_vm13  ;;  %vm974_vm1 = vcmask 1043456  }
 0x54e   :  { %v517_v33 = vsub.f32 1.0, %v516_v29 }
 0x54f   :  { %v503_v34 = vmul.f32 %v1565_v24, %v502_v31 }
 0x550   :  { %v518_v37 = vmul.f32 %v1567_v25, %v517_v33 }
 0x551   :  { %v504_v41 = vadd.f32 %v1565_v24, %v503_v34 }
 0x552   :  { %v519_v43 = vadd.f32 %v1567_v25, %v518_v37 }
 0x553   :  { %v508_v45 = vsel %vm507_vm15, %v1565_v24, %v504_v41 }
 0x554   :  { %v513_v47 = vsel %vm510_vm2, %v512_v42, %v508_v45  ;;  %v523_v48 = vsel %vm522_vm3, %v1567_v25, %v519_v43 }
 0x555   :  { %v528_v49 = vsel %vm525_vm4, %v527_v46, %v523_v48  ;;  %v535_v50 = vmul.f32 %v533_v44, %v513_v47 }
 0x556   :  { %v530_v51 = vmul.f32 2.0, %v528_v49 }
 0x558   :  { %v1489_v52 = vadd.f32 -1.0, %v530_v51 }
 0x55a   :  { %v536_v53 = vmul.f32 %v1489_v52, %v513_v47 }
 0x55c   :  { %538 = vrot.lane.b32.xlu0 %v536_v53, %s1716_s3 }
 0x5ce   :  { %v539_v54 = vpop.permute.xlu0 %538 }
 0x5cf   :  { %v541_v55 = vadd.f32 %v539_v54, %v535_v50 }
 0x5d1   :  { %1568 = vtanh.f32 %v541_v55  ;;  %v639_v24 = vrot.slane %v541_v55, 7 }
 0x5d7   :  { %v1569_v56 = vpop.eup %1568 }
 0x5d8   :  { %v2052_v57 = vmul.f32 %v1569_v56, %v528_v49 }
 0x5da   :  { %v545_v58 = vrot.slane %v2052_v57, 3  ;;  %v2058_v59 = vsel %vm972_vm5, %v2027_v26, %v2052_v57 }
 0x5dc   :  { %546 = vrot.lane.b32.xlu1 %v545_v58, %s1716_s3 }
 0x64e   :  { %v547_v60 = vpop.permute.xlu1 %546 }
 0x64f   :  { %1490 = vmatmul.msk.f32.vlgmr.msra.gmra.mxu2 %vm73_vm0, %v547_v60  ;;  %1491 = vmatmul.msk.f32.vlgmr.msra.gmra.mxu3 %vm73_vm0, %v547_v60 }
 0x6d2   :  { %v567_v61 = vpop.f32.mrf.mxu2  ;;  %v587_v62 = vpop.f32.mrf.mxu3 }
 0x6d3   :  { %v592_v63 = vrot.slane %v567_v61, 4  ;;  %v593_v4 = vrot.slane %v587_v62, 4 }
 0x6d5   :  { %v596_v5 = vadd.f32 %v592_v63, %v1951_v39  ;;  %v597_v8 = vadd.f32 %v593_v4, %v1953_v40 }
 0x6d7   :  { %v1492_v9 = vmul.f32 -1.442695, %v596_v5  ;;  %v1493_v12 = vmul.f32 -1.442695, %v597_v8 }
 0x6d9   :  { %1570 = vpow2.f32 %v1492_v9 }
 0x6da   :  { %1572 = vpow2.f32 %v1493_v12 }
 0x6df   :  { %v1571_v13 = vpop.eup %1570 }
 0x6e0   :  { %v1573_v14 = vpop.eup %1572  ;;  %v604_v15 = vadd.f32 1.0, %v1571_v13 }
 0x6e1   :  { %v605_v19 = vadd.f32 1.0, %v1573_v14 }
 0x6e2   :  { %1574 = vrcp.f32 %v604_v15  ;;  %v617_v2 = vand.u32 2147483648, %v604_v15  ;;  %v615_v7 = vand.u32 2147483647, %v604_v15  ;;  %vm611_vm8 = vweird.f32 %v604_v15 }
 0x6e3   :  { %1576 = vrcp.f32 %v605_v19  ;;  %v632_v10 = vand.u32 2147483648, %v605_v19  ;;  %v630_v16 = vand.u32 2147483647, %v605_v19  ;;  %vm626_vm12 = vweird.f32 %v605_v19 }
 0x6e4   :  { %v618_v20 = vor.u32 1.1754944e-38, %v617_v2  ;;  %vm616_vm13 = vcmp.eq.f32.partialorder %v615_v7, 8.507059e+37 }
 0x6e5   :  { %v633_v28 = vor.u32 1.1754944e-38, %v632_v10  ;;  %vm631_vm15 = vcmp.eq.f32.partialorder %v630_v16, 8.507059e+37 }
 0x6e8   :  { %v1575_v23 = vpop.eup %1574 }
 0x6e9   :  { %v1577_v26 = vpop.eup %1576  ;;  %v607_v27 = vmul.f32 %v1575_v23, %v604_v15  ;;  %vm612_vm6 = vweird.f32 %v1575_v23 }
 0x6ea   :  { %v622_v0 = vmul.f32 %v1577_v26, %v605_v19  ;;  %vm627_vm7 = vweird.f32 %v1577_v26  ;;  %vm613_vm9 = vmor %vm611_vm8, %vm612_vm6 }
 0x6eb   :  { %v608_v1 = vsub.f32 1.0, %v607_v27  ;;  %vm628_vm14 = vmor %vm626_vm12, %vm627_vm7 }
 0x6ec   :  { %v623_v3 = vsub.f32 1.0, %v622_v0 }
 0x6ed   :  { %v609_v6 = vmul.f32 %v1575_v23, %v608_v1 }
 0x6ee   :  { %v624_v11 = vmul.f32 %v1577_v26, %v623_v3 }
 0x6ef   :  { %v610_v17 = vadd.f32 %v1575_v23, %v609_v6 }
 0x6f0   :  { %v625_v21 = vadd.f32 %v1577_v26, %v624_v11 }
 0x6f1   :  { %v614_v25 = vsel %vm613_vm9, %v1575_v23, %v610_v17 }
 0x6f2   :  { %v619_v29 = vsel %vm616_vm13, %v618_v20, %v614_v25  ;;  %v629_v31 = vsel %vm628_vm14, %v1577_v26, %v625_v21  ;;  %vm976_vm13 = vcmask 1044480  }
 0x6f3   :  { %v634_v32 = vsel %vm631_vm15, %v633_v28, %v629_v31  ;;  %v641_v33 = vmul.f32 %v639_v24, %v619_v29 }
 0x6f4   :  { %v636_v34 = vmul.f32 2.0, %v634_v32 }
 0x6f6   :  { %v1494_v35 = vadd.f32 -1.0, %v636_v34 }
 0x6f8   :  { %v642_v36 = vmul.f32 %v1494_v35, %v619_v29 }
 0x6fa   :  { %644 = vrot.lane.b32.xlu2 %v642_v36, %s1716_s3 }
 0x754   :  { %v645_v37 = vpop.permute.xlu2 %644 }
 0x755   :  { %v647_v38 = vadd.f32 %v645_v37, %v641_v33 }
 0x757   :  { %1578 = vtanh.f32 %v647_v38  ;;  %v745_v26 = vrot.slane %v647_v38, 7 }
 0x75d   :  { %v1579_v41 = vpop.eup %1578 }
 0x75e   :  { %v2066_v42 = vmul.f32 %v1579_v41, %v634_v32 }
 0x760   :  { %v651_v43 = vrot.slane %v2066_v42, 4  ;;  %v2072_v44 = vsel %vm974_vm1, %v2058_v59, %v2066_v42 }
 0x762   :  { %652 = vrot.lane.b32.xlu0 %v651_v43, %s1716_s3 }
 0x7d4   :  { %v653_v45 = vpop.permute.xlu0 %652 }
 0x7d5   :  { %1495 = vmatmul.msk.f32.vlgmr.msrb.gmra.mxu0 %vm73_vm0, %v653_v45  ;;  %1496 = vmatmul.msk.f32.vlgmr.msrb.gmra.mxu1 %vm73_vm0, %v653_v45 }
 0x852   :  { %v673_v46 = vpop.f32.mrf.mxu0  ;;  %v693_v47 = vpop.f32.mrf.mxu1 }
 0x853   :  { %v698_v48 = vrot.slane %v673_v46, 3  ;;  %v699_v49 = vrot.slane %v693_v47, 3 }
 0x855   :  { %v702_v50 = vadd.f32 %v698_v48, %v1951_v39  ;;  %v703_v51 = vadd.f32 %v699_v49, %v1953_v40 }
 0x857   :  { %v1497_v52 = vmul.f32 -1.442695, %v702_v50  ;;  %v1498_v53 = vmul.f32 -1.442695, %v703_v51 }
 0x859   :  { %1580 = vpow2.f32 %v1497_v52 }
 0x85a   :  { %1582 = vpow2.f32 %v1498_v53 }
 0x85f   :  { %v1581_v54 = vpop.eup %1580 }
 0x860   :  { %v1583_v55 = vpop.eup %1582  ;;  %v710_v56 = vadd.f32 1.0, %v1581_v54 }
 0x861   :  { %v711_v58 = vadd.f32 1.0, %v1583_v55 }
 0x862   :  { %1584 = vrcp.f32 %v710_v56  ;;  %v723_v4 = vand.u32 2147483648, %v710_v56  ;;  %v721_v9 = vand.u32 2147483647, %v710_v56  ;;  %vm717_vm4 = vweird.f32 %v710_v56 }
 0x863   :  { %1586 = vrcp.f32 %v711_v58  ;;  %v738_v12 = vand.u32 2147483648, %v711_v58  ;;  %v736_v14 = vand.u32 2147483647, %v711_v58  ;;  %vm732_vm7 = vweird.f32 %v711_v58 }
 0x864   :  { %v724_v19 = vor.u32 1.1754944e-38, %v723_v4  ;;  %vm722_vm8 = vcmp.eq.f32.partialorder %v721_v9, 8.507059e+37 }
 0x865   :  { %v739_v0 = vor.u32 1.1754944e-38, %v738_v12  ;;  %vm737_vm12 = vcmp.eq.f32.partialorder %v736_v14, 8.507059e+37 }
 0x868   :  { %v1585_v59 = vpop.eup %1584 }
 0x869   :  { %v1587_v60 = vpop.eup %1586  ;;  %v713_v61 = vmul.f32 %v1585_v59, %v710_v56  ;;  %vm718_vm2 = vweird.f32 %v1585_v59 }
 0x86a   :  { %v728_v62 = vmul.f32 %v1587_v60, %v711_v58  ;;  %vm733_vm3 = vweird.f32 %v1587_v60  ;;  %vm719_vm6 = vmor %vm717_vm4, %vm718_vm2 }
 0x86b   :  { %v714_v63 = vsub.f32 1.0, %v713_v61  ;;  %vm734_vm9 = vmor %vm732_vm7, %vm733_vm3 }
 0x86c   :  { %v729_v5 = vsub.f32 1.0, %v728_v62 }
 0x86d   :  { %v715_v8 = vmul.f32 %v1585_v59, %v714_v63 }
 0x86e   :  { %v730_v13 = vmul.f32 %v1587_v60, %v729_v5 }
 0x86f   :  { %v716_v15 = vadd.f32 %v1585_v59, %v715_v8 }
 0x870   :  { %v731_v23 = vadd.f32 %v1587_v60, %v730_v13 }
 0x871   :  { %v720_v27 = vsel %vm719_vm6, %v1585_v59, %v716_v15 }
 0x872   :  { %v725_v1 = vsel %vm722_vm8, %v724_v19, %v720_v27  ;;  %v735_v2 = vsel %vm734_vm9, %v1587_v60, %v731_v23  ;;  %vm978_vm9 = vcmask 1045504  }
 0x873   :  { %v740_v3 = vsel %vm737_vm12, %v739_v0, %v735_v2  ;;  %v747_v6 = vmul.f32 %v745_v26, %v725_v1 }
 0x874   :  { %v742_v7 = vmul.f32 2.0, %v740_v3 }
 0x876   :  { %v1499_v10 = vadd.f32 -1.0, %v742_v7 }
 0x878   :  { %v748_v11 = vmul.f32 %v1499_v10, %v725_v1 }
 0x87a   :  { %750 = vrot.lane.b32.xlu1 %v748_v11, %s1716_s3 }
 0x8ec   :  { %v751_v16 = vpop.permute.xlu1 %750 }
 0x8ed   :  { %v753_v17 = vadd.f32 %v751_v16, %v747_v6 }
 0x8ef   :  { %1588 = vtanh.f32 %v753_v17  ;;  %v851_v61 = vrot.slane %v753_v17, 7 }
 0x8f5   :  { %v1589_v20 = vpop.eup %1588 }
 0x8f6   :  { %v2080_v21 = vmul.f32 %v1589_v20, %v740_v3 }
 0x8f8   :  { %v757_v24 = vrot.slane %v2080_v21, 5  ;;  %v2086_v25 = vsel %vm976_vm13, %v2072_v44, %v2080_v21 }
 0x8fa   :  { %758 = vrot.lane.b32.xlu2 %v757_v24, %s1716_s3 }
 0x954   :  { %v759_v28 = vpop.permute.xlu2 %758 }
 0x955   :  { %1500 = vmatmul.msk.f32.vlgmr.msrb.gmra.mxu2 %vm73_vm0, %v759_v28  ;;  %1501 = vmatmul.msk.f32.vlgmr.msrb.gmra.mxu3 %vm73_vm0, %v759_v28 }
 0x9d8   :  { %v779_v29 = vpop.f32.mrf.mxu2  ;;  %v799_v31 = vpop.f32.mrf.mxu3 }
 0x9d9   :  { %v804_v32 = vrot.slane %v779_v29, 2  ;;  %v805_v33 = vrot.slane %v799_v31, 2 }
 0x9db   :  { %v808_v34 = vadd.f32 %v804_v32, %v1951_v39  ;;  %v809_v35 = vadd.f32 %v805_v33, %v1953_v40 }
 0x9dd   :  { %v1502_v36 = vmul.f32 -1.442695, %v808_v34  ;;  %v1503_v37 = vmul.f32 -1.442695, %v809_v35 }
 0x9df   :  { %1590 = vpow2.f32 %v1502_v36 }
 0x9e0   :  { %1592 = vpow2.f32 %v1503_v37 }
 0x9e5   :  { %v1591_v38 = vpop.eup %1590 }
 0x9e6   :  { %v1593_v41 = vpop.eup %1592  ;;  %v816_v43 = vadd.f32 1.0, %v1591_v38 }
 0x9e7   :  { %v817_v44 = vadd.f32 1.0, %v1593_v41 }
 0x9e8   :  { %1594 = vrcp.f32 %v816_v43  ;;  %v829_v51 = vand.u32 2147483648, %v816_v43  ;;  %v827_v53 = vand.u32 2147483647, %v816_v43  ;;  %vm823_vm2 = vweird.f32 %v816_v43 }
 0x9e9   :  { %1596 = vrcp.f32 %v817_v44  ;;  %v844_v54 = vand.u32 2147483648, %v817_v44  ;;  %v842_v56 = vand.u32 2147483647, %v817_v44  ;;  %vm838_vm4 = vweird.f32 %v817_v44 }
 0x9ea   :  { %v830_v59 = vor.u32 1.1754944e-38, %v829_v51  ;;  %vm828_vm6 = vcmp.eq.f32.partialorder %v827_v53, 8.507059e+37 }
 0x9eb   :  { %v845_v63 = vor.u32 1.1754944e-38, %v844_v54  ;;  %vm843_vm8 = vcmp.eq.f32.partialorder %v842_v56, 8.507059e+37  ;;  %v1023_v56 = vld [vmem:[%s2311_s4 + $0x38] sm:$0xff] }
 0x9ec   :  { %1039 = vmatpush.msra.mxu2 %v1023_v56 }
 0x9ee   :  { %v1595_v45 = vpop.eup %1594 }
 0x9ef   :  { %v1597_v46 = vpop.eup %1596  ;;  %v819_v47 = vmul.f32 %v1595_v45, %v816_v43  ;;  %vm824_vm14 = vweird.f32 %v1595_v45 }
 0x9f0   :  { %v834_v48 = vmul.f32 %v1597_v46, %v817_v44  ;;  %vm839_vm15 = vweird.f32 %v1597_v46  ;;  %vm825_vm3 = vmor %vm823_vm2, %vm824_vm14 }
 0x9f1   :  { %v820_v49 = vsub.f32 1.0, %v819_v47  ;;  %vm840_vm7 = vmor %vm838_vm4, %vm839_vm15 }
 0x9f2   :  { %v835_v50 = vsub.f32 1.0, %v834_v48 }
 0x9f3   :  { %v821_v52 = vmul.f32 %v1595_v45, %v820_v49 }
 0x9f4   :  { %v836_v55 = vmul.f32 %v1597_v46, %v835_v50 }
 0x9f5   :  { %v822_v58 = vadd.f32 %v1595_v45, %v821_v52 }
 0x9f6   :  { %v837_v60 = vadd.f32 %v1597_v46, %v836_v55 }
 0x9f7   :  { %v826_v62 = vsel %vm825_vm3, %v1595_v45, %v822_v58  ;;  %v1022_v58 = vld [vmem:[%s2311_s4 + $0x30] sm:$0xff] }
 0x9f8   :  { %v831_v4 = vsel %vm828_vm6, %v830_v59, %v826_v62  ;;  %v841_v5 = vsel %vm840_vm7, %v1597_v46, %v837_v60  ;;  %v1021_v59 = vld [vmem:[%s2311_s4 + $0x28] sm:$0xff]  ;;  %1040 = vmatpush.msra.mxu2 %v1022_v58 }
 0x9f9   :  { %v846_v8 = vsel %vm843_vm8, %v845_v63, %v841_v5  ;;  %v853_v9 = vmul.f32 %v851_v61, %v831_v4  ;;  %vm980_vm8 = vcmask 1046528  }
 0x9fa   :  { %v848_v12 = vmul.f32 2.0, %v846_v8  ;;  %1041 = vmatpush.msra.mxu2 %v1021_v59 }
 0x9fc   :  { %v1504_v13 = vadd.f32 -1.0, %v848_v12  ;;  %v989_v12 = vrot.slane %v2066_v42, 1 }
 0x9fe   :  { %v854_v14 = vmul.f32 %v1504_v13, %v831_v4 }
 0xa00   :  { %856 = vrot.lane.b32.xlu0 %v854_v14, %s1716_s3  ;;  %v991_v14 = vrot.slane %v2052_v57, 7  ;;  %v1017_v57 = vld [vmem:[%s2311_s4 + $0x8] sm:$0xff] }
 0xa72   :  { %v857_v15 = vpop.permute.xlu0 %856 }
 0xa73   :  { %v859_v19 = vadd.f32 %v857_v15, %v853_v9  ;;  %v987_v9 = vrot.slane %v2080_v21, 3  ;;  %v997_v21 = vrot.slane %v1961_v30, 1  ;;  %v1018_v30 = vld [vmem:[%s2311_s4 + $0x10] sm:$0xff] }
 0xa75   :  { %1598 = vtanh.f32 %v859_v19  ;;  %v957_v46 = vrot.slane %v859_v19, 7  ;;  %v993_v19 = vrot.slane %v2019_v18, 5  ;;  %v1020_v18 = vld [vmem:[%s2311_s4 + $0x20] sm:$0xff] }
 0xa76   :  { %1042 = vmatpush.msra.mxu2 %v1020_v18 }
 0xa7b   :  { %v1599_v23 = vpop.eup %1598 }
 0xa7c   :  { %v2094_v26 = vmul.f32 %v1599_v23, %v846_v8 }
 0xa7e   :  { %v863_v27 = vrot.slane %v2094_v26, 6  ;;  %v2100_v0 = vsel %vm978_vm9, %v2086_v25, %v2094_v26  ;;  %v985_v4 = vrot.slane %v2094_v26, 5  ;;  %v995_v26 = vrot.slane %v1990_v22, 3  ;;  %v1019_v22 = vld [vmem:[%s2311_s4 + $0x18] sm:$0xff] }
 0xa7f   :  { %1043 = vmatpush.msra.mxu2 %v1019_v22 }
 0xa80   :  { %864 = vrot.lane.b32.xlu1 %v863_v27, %s1716_s3 }
 0xa81   :  { %1044 = vmatpush.msra.mxu2 %v1018_v30 }
 0xa83   :  { %1045 = vmatpush.msra.mxu2 %v1017_v57 }
 0xaf2   :  { %v865_v1 = vpop.permute.xlu1 %864 }
 0xaf3   :  { %1505 = vmatmul.msk.f32.vlgmr.msra.gmra.mxu0 %vm73_vm0, %v865_v1  ;;  %1506 = vmatmul.msk.f32.vlgmr.msra.gmra.mxu1 %vm73_vm0, %v865_v1 }
 0xb70   :  { %v885_v2 = vpop.f32.mrf.mxu0  ;;  %v905_v3 = vpop.f32.mrf.mxu1 }
 0xb71   :  { %v910_v6 = vrot.slane %v885_v2, 1  ;;  %v911_v7 = vrot.slane %v905_v3, 1  ;;  %v1016_v2 = vld [vmem:[%s2311_s4] sm:$0xff] }
 0xb72   :  { %1046 = vmatpush.msra.mxu2 %v1016_v2 }
 0xb73   :  { %v914_v10 = vadd.f32 %v910_v6, %v1951_v39  ;;  %v915_v11 = vadd.f32 %v911_v7, %v1953_v40 }
 0xb75   :  { %v1507_v16 = vmul.f32 -1.442695, %v914_v10  ;;  %v1508_v17 = vmul.f32 -1.442695, %v915_v11  ;;  %v1083_v10 = vlaneseq }
 0xb77   :  { %1600 = vpow2.f32 %v1507_v16  ;;  %v2152_v11 = vand.u32 127, %v1083_v10  ;;  %v2157_v16 = vld [vmem:[%s2314_s7] sm:$0xff] }
 0xb78   :  { %1602 = vpow2.f32 %v1508_v17  ;;  %v1717_v17 = vmov -10000.0  }
 0xb7d   :  { %v1601_v20 = vpop.eup %1600 }
 0xb7e   :  { %v1603_v24 = vpop.eup %1602  ;;  %v922_v25 = vadd.f32 1.0, %v1601_v20 }
 0xb7f   :  { %v923_v28 = vadd.f32 1.0, %v1603_v24 }
 0xb80   :  { %1604 = vrcp.f32 %v922_v25  ;;  %v935_v36 = vand.u32 2147483648, %v922_v25  ;;  %v933_v40 = vand.u32 2147483647, %v922_v25  ;;  %vm929_vm15 = vweird.f32 %v922_v25 }
 0xb81   :  { %1606 = vrcp.f32 %v923_v28  ;;  %v950_v37 = vand.u32 2147483648, %v923_v28  ;;  %v948_v41 = vand.u32 2147483647, %v923_v28  ;;  %vm944_vm3 = vweird.f32 %v923_v28 }
 0xb82   :  { %v936_v44 = vor.u32 1.1754944e-38, %v935_v36  ;;  %vm934_vm4 = vcmp.eq.f32.partialorder %v933_v40, 8.507059e+37  ;;  %v2182_v36 = vld [vmem:[%s2313_s6] sm:$0xff] }
 0xb83   :  { %v951_v48 = vor.u32 1.1754944e-38, %v950_v37  ;;  %vm949_vm7 = vcmp.eq.f32.partialorder %v948_v41, 8.507059e+37 }
 0xb86   :  { %v1605_v29 = vpop.eup %1604 }
 0xb87   :  { %v1607_v31 = vpop.eup %1606  ;;  %v925_v32 = vmul.f32 %v1605_v29, %v922_v25  ;;  %vm930_vm12 = vweird.f32 %v1605_v29 }
 0xb88   :  { %v940_v33 = vmul.f32 %v1607_v31, %v923_v28  ;;  %vm945_vm14 = vweird.f32 %v1607_v31  ;;  %vm931_vm2 = vmor %vm929_vm15, %vm930_vm12  ;;  %v1529_v28 = vld [vmem:[%s2312_s5] ss:$0 sm:$0xff]  ;;  %vm1288_vm15 = vcmask 64519  }
 0xb89   :  { %v926_v34 = vsub.f32 1.0, %v925_v32  ;;  %vm946_vm6 = vmor %vm944_vm3, %vm945_vm14  ;;  %v1718_v32 = vmov 0  }
 0xb8a   :  { %v941_v35 = vsub.f32 1.0, %v940_v33  ;;  %1524 = vset.pattern.permute.xlu1 %v1718_v32 }
 0xb8b   :  { %v927_v39 = vmul.f32 %v1605_v29, %v926_v34 }
 0xb8c   :  { %v942_v38 = vmul.f32 %v1607_v31, %v941_v35 }
 0xb8d   :  { %v928_v43 = vadd.f32 %v1605_v29, %v927_v39 }
 0xb8e   :  { %v943_v45 = vadd.f32 %v1607_v31, %v942_v38 }
 0xb8f   :  { %v932_v47 = vsel %vm931_vm2, %v1605_v29, %v928_v43  ;;  %vm1309_vm2 = vcmask 7175  }
 0xb90   :  { %v937_v49 = vsel %vm934_vm4, %v936_v44, %v932_v47  ;;  %v947_v50 = vsel %vm946_vm6, %v1607_v31, %v943_v45 }
 0xb91   :  { %v952_v51 = vsel %vm949_vm7, %v951_v48, %v947_v50  ;;  %v959_v52 = vmul.f32 %v957_v46, %v937_v49 }
 0xb92   :  { %v954_v53 = vmul.f32 2.0, %v952_v51 }
 0xb94   :  { %v1509_v54 = vadd.f32 -1.0, %v954_v53 }
 0xb96   :  { %v960_v55 = vmul.f32 %v1509_v54, %v937_v49 }
 0xb98   :  { %962 = vrot.lane.b32.xlu2 %v960_v55, %s1716_s3 }
 0xbf2   :  { %v963_v60 = vpop.permute.xlu2 %962 }
 0xbf3   :  { %v965_v61 = vadd.f32 %v963_v60, %v959_v52 }
 0xbf5   :  { %1608 = vtanh.f32 %v965_v61 }
 0xbfb   :  { %v1609_v62 = vpop.eup %1608 }
 0xbfc   :  { %v967_v63 = vmul.f32 %v1609_v62, %v952_v51  ;;  %v1719_v51 = vmov 2  }
 0xbfd   :  { %1525 = vset.pattern.permute.xlu2 %v1719_v51 }
 0xbfe   :  { %v981_v5 = vsel %vm980_vm8, %v2100_v0, %v967_v63  ;;  %v983_v8 = vrot.slane %v967_v63, 7 }
 0xbff   :  { %1007 = vrot.lane.b32.xlu0 %v981_v5, %s1716_s3 }
 0xc00   :  { %v999_v13 = vsel %vm968_vm10, %v983_v8, %v985_v4  ;;  %vm1014_vm10 = vcmask 261120  }
 0xc01   :  { %v1000_v15 = vsel %vm970_vm11, %v999_v13, %v987_v9  ;;  %vm1089_vm11 = vcmp.eq.s32.totalorder %v2152_v11, 6 }
 0xc02   :  { %v1001_v23 = vsel %vm972_vm5, %v1000_v15, %v989_v12  ;;  %v1090_v20 = vsel %vm1089_vm11, 0.0, %v1717_v17  ;;  %vm1092_vm5 = vcmask 64512  }
 0xc03   :  { %v1002_v27 = vsel %vm974_vm1, %v1001_v23, %v991_v14  ;;  %v2163_v24 = vadd.f32 %v1090_v20, %v2157_v16 }
 0xc04   :  { %v1003_v0 = vsel %vm976_vm13, %v1002_v27, %v993_v19  ;;  %v1720_v19 = vmov 4  }
 0xc05   :  { %v1004_v42 = vsel %vm978_vm9, %v1003_v0, %v995_v26  ;;  %v1093_v25 = vsel %vm1092_vm5, %v2163_v24, -inf }
 0xc06   :  { %v1005_v1 = vsel %vm980_vm8, %v1004_v42, %v997_v21  ;;  %1094 = vmax.xlane.f32.xlu2 %v1093_v25 }
 0xc07   :  { %1011 = vrot.lane.b32.xlu1 %v1005_v1, %s1716_s3  ;;  %s1723_s3 = smov [#allocation6]  }
 0xc08   :  { %s1438_s12 = sshll.u32 %s1723_s3, 4  ;;  %s1439_s12 = int_to_ptr.vmem [resolvable:$true] %s1438_s12 }
 0xc71   :  { %v1008_v3 = vpop.permute.xlu0 %1007 }
 0xc79   :  { %v1012_v6 = vpop.permute.xlu1 %1011  ;;  %v2173_v33 = vpop.xlane.xlu2 %1094 }
 0xc7a   :  { %v1015_v7 = vsel %vm1014_vm10, %v1008_v3, %v1012_v6 }
 0xc7b   :  { %1510 = vmatmul.msk.f32.vlgmr.msra.gmra.mxu2 %vm73_vm0, %v1015_v7 }
 0xcfe   :  { %v1048_v29 = vpop.f32.mrf.mxu2 }
 0xcff   :  { %v2170_v31 = vadd.f32 %v1529_v28, %v1048_v29  ;;  %v1721_v29 = vmov 6  }
 0xd01   :  { %1051 = vxpose.xlu0.b32.start.end [1/1] (short) (narrow) %v2170_v31, 8 }
 0xd68   :  { %1528 = vset.pattern.permute.xlu0 %v1721_v29 }
 0xda5   :  { %v2175_v34 = vpop.trf.xlu0 }
 0xda6   :  { %v1113_v35 = vadd.f32 %v2173_v33, %v2175_v34 }
 0xda8   :  { %1116 = vperm.xlu1 %1524, %v1113_v35  }
 0xdb0   :  { %1526 = vset.pattern.permute.xlu1 %v1720_v19 }
 0xe1a   :  { %v1117_v39 = vpop.permute.xlu1 %1116 }
 0xe1b   :  { %v2185_v40 = vadd.f32 %v1117_v39, %v2182_v36 }
 0xe1d   :  { %v1120_v37 = vsel %vm1092_vm5, %v2185_v40, -inf }
 0xe1e   :  { %v1121_v38 = vrot.slane %v1120_v37, 4 }
 0xe20   :  { %v1122_v41 = vmax.f32 %v1120_v37, %v1121_v38 }
 0xe22   :  { %v1123_v43 = vrot.slane %v1122_v41, 2 }
 0xe24   :  { %v1124_v44 = vmax.f32 %v1122_v41, %v1123_v43 }
 0xe26   :  { %v1125_v45 = vrot.slane %v1124_v44, 1 }
 0xe28   :  { %v2189_v46 = vmax.f32 %v1124_v44, %v1125_v45 }
 0xe2a   :  { %vm1127_vm0 = vcmp.eq.f32.partialorder %v2185_v40, %v2189_v46  ;;  %v1139_v47 = vadd.f32 %v2189_v46, %v2170_v31 }
 0xe2c   :  { %v1140_v48 = vperm.slane %v1139_v47, 1 }
 0xe2e   :  { %v1141_v49 = vadd.f32 %v1140_v48, %v2157_v16 }
 0xe30   :  { %v1142_v50 = vsel %vm1092_vm5, %v1141_v49, -inf }
 0xe31   :  { %1143 = vmax.xlane.f32.xlu1 %v1142_v50 }
 0xea4   :  { %v1144_v52 = vpop.xlane.xlu1 %1143 }
 0xea5   :  { %v1162_v53 = vadd.f32 %v1144_v52, %v2175_v34  ;;  %vm1145_vm1 = vcmp.eq.f32.partialorder %v1141_v49, %v1144_v52 }
 0xea6   :  { %v1146_v8 = vsel %vm1145_vm1, %v2152_v11, 8 }
 0xea7   :  { %1165 = vperm.xlu2 %1525, %v1162_v53   ;;  %v1147_v13 = vsel %vm1092_vm5, %v1146_v8, 2147483647 }
 0xea8   :  { %v1149_v14 = vshra.s32 %v1147_v13, 16  ;;  %v1148_v27 = vand.u32 65535, %v1147_v13 }
 0xeaa   :  { %v1151_v15 = vcvt.s32.f32 %v1149_v14  ;;  %v1150_v0 = vcvt.s32.f32 %v1148_v27 }
 0xf01   :  { %v1166_v54 = vpop.permute.xlu2 %1165 }
 0xf02   :  { %v2199_v55 = vadd.f32 %v1166_v54, %v2182_v36 }
 0xf04   :  { %v1169_v56 = vsel %vm1092_vm5, %v2199_v55, -inf }
 0xf05   :  { %v1170_v58 = vrot.slane %v1169_v56, 4 }
 0xf07   :  { %v1171_v59 = vmax.f32 %v1169_v56, %v1170_v58 }
 0xf09   :  { %v1172_v60 = vrot.slane %v1171_v59, 2 }
 0xf0b   :  { %v1173_v61 = vmax.f32 %v1171_v59, %v1172_v60 }
 0xf0d   :  { %v1174_v62 = vrot.slane %v1173_v61, 1 }
 0xf0f   :  { %v2203_v63 = vmax.f32 %v1173_v61, %v1174_v62 }
 0xf11   :  { %vm1176_vm13 = vcmp.eq.f32.partialorder %v2199_v55, %v2203_v63  ;;  %v1188_v4 = vadd.f32 %v2203_v63, %v2170_v31 }
 0xf13   :  { %v1189_v5 = vperm.slane %v1188_v4, 3  ;;  %v2247_v4 = vshrl.u32 %v1083_v10, 7 }
 0xf15   :  { %v2211_v9 = vadd.f32 %v1189_v5, %v2157_v16 }
 0xf17   :  { %v1191_v12 = vsel %vm1092_vm5, %v2211_v9, -inf }
 0xf18   :  { %1192 = vmax.xlane.f32.xlu0 %v1191_v12 }
 0xf20   :  { %1152 = vmin.xlane.f32.xlu0 %v1151_v15 }
 0xf8b   :  { %v2216_v23 = vpop.xlane.xlu0 %1192 }
 0xf8c   :  { %v1211_v26 = vadd.f32 %v2216_v23, %v2175_v34  ;;  %vm1194_vm1 = vcmp.eq.f32.partialorder %v2211_v9, %v2216_v23 }
 0xf8e   :  { %1214 = vperm.xlu1 %1526, %v1211_v26  }
 0xf93   :  { %v2220_v21 = vpop.xlane.xlu0 %1152 }
 0xf94   :  { %vm1154_vm9 = vcmp.eq.f32.partialorder %v1151_v15, %v2220_v21 }
 0xf95   :  { %v1155_v42 = vsel %vm1154_vm9, %v1150_v0, inf }
 0xf96   :  { %1156 = vmin.xlane.f32.xlu0 %v1155_v42  ;;  %1527 = vset.pattern.permute.xlu1 %v1721_v29 }
0x1000   :  { %v1215_v1 = vpop.permute.xlu1 %1214 }
0x1001   :  { %v2224_v18 = vadd.f32 %v1215_v1, %v2182_v36 }
0x1003   :  { %v1218_v22 = vsel %vm1092_vm5, %v2224_v18, -inf }
0x1004   :  { %v1219_v30 = vrot.slane %v1218_v22, 4 }
0x1006   :  { %v1220_v57 = vmax.f32 %v1218_v22, %v1219_v30 }
0x1008   :  { %v1221_v2 = vrot.slane %v1220_v57, 2 }
0x100a   :  { %v1222_v3 = vmax.f32 %v1220_v57, %v1221_v2  ;;  %v1195_v57 = vsel %vm1194_vm1, %v2152_v11, 8  ;;  %vm1355_vm1 = vcmp.eq.s32.totalorder %v2152_v11, 4 }
0x100c   :  { %v1223_v6 = vrot.slane %v1222_v3, 1 }
0x100e   :  { %v2228_v7 = vmax.f32 %v1222_v3, %v1223_v6 }
0x1010   :  { %vm1225_vm12 = vcmp.eq.f32.partialorder %v2224_v18, %v2228_v7  ;;  %v1237_v17 = vadd.f32 %v2228_v7, %v2170_v31 }
0x1012   :  { %v1238_v20 = vperm.slane %v1237_v17, 5 }
0x1014   :  { %v1239_v25 = vadd.f32 %v1238_v20, %v2157_v16  ;;  %v1196_v20 = vsel %vm1092_vm5, %v1195_v57, 2147483647 }
0x1015   :  { %v1198_v29 = vshra.s32 %v1196_v20, 16 }
0x1016   :  { %v1240_v28 = vsel %vm1092_vm5, %v1239_v25, -inf }
0x1017   :  { %1241 = vmax.xlane.f32.xlu2 %v1240_v28  ;;  %v1200_v23 = vcvt.s32.f32 %v1198_v29 }
0x108a   :  { %v1242_v32 = vpop.xlane.xlu2 %1241 }
0x108b   :  { %v1260_v35 = vadd.f32 %v1242_v32, %v2175_v34  ;;  %vm1243_vm4 = vcmp.eq.f32.partialorder %v1239_v25, %v1242_v32 }
0x108d   :  { %1263 = vperm.xlu1 %1527, %v1260_v35   ;;  %v1226_v35 = vsel %vm1225_vm12, %v2247_v4, 8 }
0x10ff   :  { %v1264_v39 = vpop.permute.xlu1 %1263 }
0x1100   :  { %v1266_v37 = vadd.f32 %v1264_v39, %v2182_v36  ;;  %v1227_v39 = vsel %vm1092_vm5, %v1226_v35, 2147483647 }
0x1102   :  { %v1267_v38 = vsel %vm1092_vm5, %v1266_v37, -inf }
0x1103   :  { %v1268_v41 = vrot.slane %v1267_v38, 4 }
0x1105   :  { %v1269_v43 = vmax.f32 %v1267_v38, %v1268_v41 }
0x1107   :  { %v1270_v44 = vrot.slane %v1269_v43, 2 }
0x1109   :  { %v1271_v45 = vmax.f32 %v1269_v43, %v1270_v44 }
0x110b   :  { %v1272_v47 = vrot.slane %v1271_v45, 1 }
0x110d   :  { %v1273_v48 = vmax.f32 %v1271_v45, %v1272_v47 }
0x110f   :  { %vm1274_vm14 = vcmp.eq.f32.partialorder %v1266_v37, %v1273_v48  ;;  %v1286_v49 = vadd.f32 %v1273_v48, %v2170_v31  ;;  %v1244_v31 = vsel %vm1243_vm4, %v2152_v11, 8  ;;  %v1228_v37 = vrot.slane %v1227_v39, 4 }
0x1110   :  { %v1245_v60 = vsel %vm1092_vm5, %v1244_v31, 2147483647  ;;  %v1275_v5 = vsel %vm1274_vm14, %v2247_v4, 8 }
0x1111   :  { %v1287_v50 = vadd.f32 %v1286_v49, %v2157_v16  ;;  %v1247_v61 = vshra.s32 %v1245_v60, 16  ;;  %v1276_v8 = vsel %vm1092_vm5, %v1275_v5, 2147483647  ;;  %v1246_v28 = vand.u32 65535, %v1245_v60 }
0x1112   :  { %v1277_v12 = vrot.slane %v1276_v8, 4 }
0x1113   :  { %v1289_v34 = vsel %vm1288_vm15, %v1287_v50, -inf  ;;  %v1249_v62 = vcvt.s32.f32 %v1247_v61  ;;  %v1248_v9 = vcvt.s32.f32 %v1246_v28 }
0x1114   :  { %1290 = vmax.xlane.f32.xlu1 %v1289_v34  ;;  %vm1278_vm7 = vcmp.lt.s32.totalorder %v1276_v8, %v1277_v12 }
0x1115   :  { %v1279_v13 = vsel %vm1278_vm7, %v1276_v8, %v1277_v12 }
0x1116   :  { %v1280_v14 = vrot.slane %v1279_v13, 2 }
0x1118   :  { %vm1281_vm8 = vcmp.lt.s32.totalorder %v1279_v13, %v1280_v14 }
0x1119   :  { %v1282_v15 = vsel %vm1281_vm8, %v1279_v13, %v1280_v14 }
0x111a   :  { %v1283_v26 = vrot.slane %v1282_v15, 1 }
0x111c   :  { %vm1284_vm10 = vcmp.lt.s32.totalorder %v1282_v15, %v1283_v26 }
0x111d   :  { %v1285_v10 = vsel %vm1284_vm10, %v1282_v15, %v1283_v26 }
0x1187   :  { %v1291_v51 = vpop.xlane.xlu1 %1290 }
0x1188   :  { %vm1292_vm3 = vcmp.eq.f32.partialorder %v1287_v50, %v1291_v51  ;;  %1310 = vst.msk [vmem:[#allocation5 - $0x7] sm:$0x80] %vm1309_vm2, %v1291_v51  ;;  %vm1229_vm2 = vcmp.lt.s32.totalorder %v1227_v39, %v1228_v37 }
0x1189   :  { %v1293_v36 = vsel %vm1292_vm3, %v2152_v11, 8  ;;  %vm1311_vm3 = vcmp.eq.s32.totalorder %v2152_v11, 7  ;;  %v1230_v49 = vsel %vm1229_vm2, %v1227_v39, %v1228_v37  ;;  %vm1365_vm2 = vcmp.eq.s32.totalorder %v2152_v11, 3  ;;  %1432 = dma.vmem_to_hbm [thread:$0]  %s1428_s1, 16, %s1430_s11, [#allocation4]  }
0x118a   :  { %v1294_v52 = vsel %vm1288_vm15, %v1293_v36, 2147483647  ;;  %v1231_v51 = vrot.slane %v1230_v49, 2 }
0x118b   :  { %v1296_v53 = vshra.s32 %v1294_v52, 16  ;;  %v1295_v56 = vand.u32 65535, %v1294_v52 }
0x118c   :  { %vm1232_vm4 = vcmp.lt.s32.totalorder %v1230_v49, %v1231_v51 }
0x118d   :  { %v1298_v54 = vcvt.s32.f32 %v1296_v53  ;;  %v1297_v16 = vcvt.s32.f32 %v1295_v56 }
0x118f   :  { %1299 = vmin.xlane.f32.xlu2 %v1298_v54 }
0x1202   :  { %v1300_v58 = vpop.xlane.xlu2 %1299 }
0x1203   :  { %vm1301_vm6 = vcmp.eq.f32.partialorder %v1298_v54, %v1300_v58  ;;  %v1306_v19 = vcvt.f32.s32 %v1300_v58  ;;  %v1233_v58 = vsel %vm1232_vm4, %v1230_v49, %v1231_v51 }
0x1204   :  { %v1302_v59 = vsel %vm1301_vm6, %v1297_v16, inf }
0x1205   :  { %1303 = vmin.xlane.f32.xlu2 %v1302_v59  ;;  %v1307_v0 = vshll.u32 %v1306_v19, 16  ;;  %v1234_v59 = vrot.slane %v1233_v58, 1 }
0x1207   :  { %vm1235_vm6 = vcmp.lt.s32.totalorder %v1233_v58, %v1234_v59 }
0x1208   :  { %v1236_v5 = vsel %vm1235_vm6, %v1233_v58, %v1234_v59  ;;  %v1157_v58 = vpop.xlane.xlu0 %1156  ;;  %vm1382_vm6 = vcmp.eq.s32.totalorder %v2152_v11, 2 }
0x120d   :  { %1250 = vmin.xlane.f32.xlu2 %v1249_v62 }
0x1278   :  { %v1304_v27 = vpop.xlane.xlu2 %1303 }
0x1279   :  { %v1305_v42 = vcvt.f32.s32 %v1304_v27 }
0x127b   :  { %v1308_v1 = vadd.s32 %v1307_v0, %v1305_v42  ;;  %v1197_v0 = vand.u32 65535, %v1196_v20 }
0x127d   :  { %vm1313_vm9 = vcmp.eq.s32.totalorder %v2152_v11, %v1308_v1  ;;  %v1312_v50 = vsel %vm1311_vm3, %v1308_v1, 0  ;;  %v1199_v42 = vcvt.s32.f32 %v1197_v0  ;;  %vm1096_vm3 = vcmp.eq.f32.partialorder %v2163_v24, %v2173_v33 }
0x127e   :  { %v1314_v22 = vsel %vm1313_vm9, %v1285_v10, 0  ;;  %v1177_v10 = vsel %vm1176_vm13, %v2247_v4, 8  ;;  %v1128_v24 = vsel %vm1127_vm0, %v2247_v4, 8 }
0x127f   :  { %v1315_v30 = vsel %vm1288_vm15, %v1314_v22, 0  ;;  %v1178_v22 = vsel %vm1092_vm5, %v1177_v10, 2147483647  ;;  %v1129_v33 = vsel %vm1092_vm5, %v1128_v24, 2147483647 }
0x1280   :  { %v1316_v2 = vand.u32 65535, %v1315_v30  ;;  %v1317_v3 = vshrl.u32 %v1315_v30, 16  ;;  %v1251_v25 = vpop.xlane.xlu2 %1250  ;;  %v1179_v30 = vrot.slane %v1178_v22, 4 }
0x1281   :  { %vm1252_vm14 = vcmp.eq.f32.partialorder %v1249_v62, %v1251_v25  ;;  %v1257_v47 = vcvt.f32.s32 %v1251_v25 }
0x1282   :  { %v1318_v6 = vcvt.s32.f32 %v1316_v2  ;;  %v1319_v17 = vcvt.s32.f32 %v1317_v3  ;;  %v1253_v32 = vsel %vm1252_vm14, %v1248_v9, inf  ;;  %vm1180_vm10 = vcmp.lt.s32.totalorder %v1178_v22, %v1179_v30 }
0x1283   :  { %v1258_v36 = vshll.u32 %v1257_v47, 16  ;;  %v1181_v28 = vsel %vm1180_vm10, %v1178_v22, %v1179_v30  ;;  %vm1392_vm10 = vcmp.eq.s32.totalorder %v2152_v11, 1 }
0x1284   :  { %1320 = vadd.xlane.f32.xlu1 %v1318_v6  ;;  %1322 = vadd.xlane.f32.xlu2 %v1319_v17 }
0x128c   :  { %1254 = vmin.xlane.f32.xlu2 %v1253_v32  ;;  %1201 = vmin.xlane.f32.xlu1 %v1200_v23 }
0x12f7   :  { %v1321_v38 = vpop.xlane.xlu1 %1320  ;;  %v1323_v41 = vpop.xlane.xlu2 %1322 }
0x12f8   :  { %v1325_v43 = vcvt.f32.s32 %v1323_v41  ;;  %v1324_v44 = vcvt.f32.s32 %v1321_v38 }
0x12fa   :  { %v1326_v45 = vshll.u32 %v1325_v43, 16 }
0x12fc   :  { %v1327_v48 = vadd.s32 %v1326_v45, %v1324_v44 }
0x12fe   :  { %v1328_v34 = vsel %vm1089_vm11, %v1327_v48, %v1312_v50  ;;  %v1329_v18 = vperm.slane %v1327_v48, 7  ;;  %vm1338_vm11 = vcmp.eq.s32.totalorder %v2152_v11, 5 }
0x12ff   :  { %v1255_v7 = vpop.xlane.xlu2 %1254  ;;  %v1202_v27 = vpop.xlane.xlu1 %1201 }
0x1300   :  { %v1256_v52 = vcvt.f32.s32 %v1255_v7  ;;  %vm1330_vm12 = vcmp.eq.s32.totalorder %v2247_v4, %v1329_v18  ;;  %vm1203_vm8 = vcmp.eq.f32.partialorder %v1200_v23, %v1202_v27  ;;  %v1208_v20 = vcvt.f32.s32 %v1202_v27 }
0x1301   :  { %v1204_v1 = vsel %vm1203_vm8, %v1199_v42, inf  ;;  %v1182_v23 = vrot.slane %v1181_v28, 2  ;;  %v1097_v18 = vsel %vm1096_vm3, %v2152_v11, 8 }
0x1302   :  { %v1259_v53 = vadd.s32 %v1258_v36, %v1256_v52  ;;  %v1209_v32 = vshll.u32 %v1208_v20, 16 }
0x1303   :  { %vm1183_vm9 = vcmp.lt.s32.totalorder %v1181_v28, %v1182_v23 }
0x1304   :  { %v1331_v54 = vsel %vm1330_vm12, %v1259_v53, 0  ;;  %v1184_v38 = vsel %vm1183_vm9, %v1181_v28, %v1182_v23  ;;  %v1098_v53 = vsel %vm1092_vm5, %v1097_v18, 2147483647  ;;  %vm1420_vm9 = vcmask 0  }
0x1305   :  { %v1332_v56 = vrot.slane %v1331_v54, 4  ;;  %v1185_v43 = vrot.slane %v1184_v38, 1  ;;  %v1099_v40 = vand.u32 65535, %v1098_v53 }
0x1307   :  { %v1333_v31 = vadd.s32 %v1332_v56, %v1331_v54  ;;  %vm1186_vm14 = vcmp.lt.s32.totalorder %v1184_v38, %v1185_v43  ;;  %v1100_v54 = vshra.s32 %v1098_v53, 16  ;;  %v1101_v27 = vcvt.s32.f32 %v1099_v40 }
0x1308   :  { %v1187_v48 = vsel %vm1186_vm14, %v1184_v38, %v1185_v43 }
0x1309   :  { %v1334_v16 = vrot.slane %v1333_v31, 2  ;;  %v1102_v56 = vcvt.s32.f32 %v1100_v54 }
0x130b   :  { %v1335_v60 = vadd.s32 %v1334_v16, %v1333_v31  ;;  %v1130_v31 = vrot.slane %v1129_v33, 4  ;;  %v1159_v16 = vcvt.f32.s32 %v2220_v21 }
0x130d   :  { %v1336_v61 = vrot.slane %v1335_v60, 1  ;;  %vm1131_vm4 = vcmp.lt.s32.totalorder %v1129_v33, %v1130_v31 }
0x130f   :  { %v1337_v62 = vadd.s32 %v1336_v61, %v1335_v60  ;;  %v1132_v61 = vsel %vm1131_vm4, %v1129_v33, %v1130_v31 }
0x1311   :  { %vm1340_vm7 = vcmp.eq.s32.totalorder %v2152_v11, %v1337_v62  ;;  %v1339_v8 = vsel %vm1338_vm11, %v1337_v62, %v1328_v34 }
0x1312   :  { %v1341_v12 = vsel %vm1340_vm7, %v1236_v5, 0  ;;  %v1158_v5 = vcvt.f32.s32 %v1157_v58 }
0x1313   :  { %v1342_v13 = vsel %vm1092_vm5, %v1341_v12, 0 }
0x1314   :  { %v1344_v14 = vshrl.u32 %v1342_v13, 16  ;;  %v1343_v15 = vand.u32 65535, %v1342_v13  ;;  %v1133_v13 = vrot.slane %v1132_v61, 2 }
0x1316   :  { %v1346_v19 = vcvt.s32.f32 %v1344_v14  ;;  %v1345_v26 = vcvt.s32.f32 %v1343_v15  ;;  %v1160_v14 = vshll.u32 %v1159_v16, 16  ;;  %vm1134_vm11 = vcmp.lt.s32.totalorder %v1132_v61, %v1133_v13 }
0x1317   :  { %v1135_v10 = vsel %vm1134_vm11, %v1132_v61, %v1133_v13 }
0x1318   :  { %1349 = vadd.xlane.f32.xlu2 %v1346_v19  ;;  %1347 = vadd.xlane.f32.xlu1 %v1345_v26  ;;  %v1161_v15 = vadd.s32 %v1160_v14, %v1158_v5  ;;  %v1136_v30 = vrot.slane %v1135_v10, 1 }
0x131a   :  { %vm1137_vm8 = vcmp.lt.s32.totalorder %v1135_v10, %v1136_v30 }
0x1320   :  { %1205 = vmin.xlane.f32.xlu2 %v1204_v1 }
0x138b   :  { %v1350_v57 = vpop.xlane.xlu2 %1349  ;;  %v1348_v2 = vpop.xlane.xlu1 %1347 }
0x138c   :  { %v1352_v3 = vcvt.f32.s32 %v1350_v57  ;;  %v1351_v17 = vcvt.f32.s32 %v1348_v2 }
0x138e   :  { %v1353_v6 = vshll.u32 %v1352_v3, 16 }
0x1390   :  { %v1354_v25 = vadd.s32 %v1353_v6, %v1351_v17  ;;  %v1138_v6 = vsel %vm1137_vm8, %v1135_v10, %v1136_v30 }
0x1392   :  { %v1356_v29 = vsel %vm1355_vm1, %v1354_v25, %v1339_v8  ;;  %vm1357_vm13 = vcmp.eq.s32.totalorder %v2247_v4, %v1354_v25 }
0x1393   :  { %v1206_v9 = vpop.xlane.xlu2 %1205 }
0x1394   :  { %v1207_v55 = vcvt.f32.s32 %v1206_v9 }
0x1396   :  { %v1210_v63 = vadd.s32 %v1209_v32, %v1207_v55 }
0x1398   :  { %v1358_v35 = vsel %vm1357_vm13, %v1210_v63, 0 }
0x1399   :  { %v1359_v39 = vrot.slane %v1358_v35, 4 }
0x139b   :  { %v1360_v37 = vadd.s32 %v1359_v39, %v1358_v35 }
0x139d   :  { %v1361_v41 = vrot.slane %v1360_v37, 2 }
0x139f   :  { %v1362_v44 = vadd.s32 %v1361_v41, %v1360_v37 }
0x13a1   :  { %v1363_v45 = vrot.slane %v1362_v44, 1 }
0x13a3   :  { %v1364_v47 = vadd.s32 %v1363_v45, %v1362_v44 }
0x13a5   :  { %vm1367_vm12 = vcmp.eq.s32.totalorder %v2152_v11, %v1364_v47  ;;  %v1366_v49 = vsel %vm1365_vm2, %v1364_v47, %v1356_v29 }
0x13a6   :  { %v1368_v50 = vsel %vm1367_vm12, %v1187_v48, 0 }
0x13a7   :  { %v1369_v34 = vsel %vm1092_vm5, %v1368_v50, 0 }
0x13a8   :  { %v1371_v7 = vshrl.u32 %v1369_v34, 16  ;;  %v1370_v51 = vand.u32 65535, %v1369_v34 }
0x13aa   :  { %v1373_v36 = vcvt.s32.f32 %v1371_v7  ;;  %v1372_v52 = vcvt.s32.f32 %v1370_v51 }
0x13ac   :  { %1376 = vadd.xlane.f32.xlu1 %v1373_v36  ;;  %1374 = vadd.xlane.f32.xlu2 %v1372_v52 }
0x13b4   :  { %1103 = vmin.xlane.f32.xlu1 %v1102_v56 }
0x141f   :  { %v1377_v59 = vpop.xlane.xlu1 %1376  ;;  %v1375_v60 = vpop.xlane.xlu2 %1374 }
0x1420   :  { %v1379_v62 = vcvt.f32.s32 %v1377_v59  ;;  %v1378_v12 = vcvt.f32.s32 %v1375_v60 }
0x1422   :  { %v1380_v8 = vshll.u32 %v1379_v62, 16 }
0x1424   :  { %v1381_v46 = vadd.s32 %v1380_v8, %v1378_v12 }
0x1426   :  { %v1383_v19 = vsel %vm1382_vm6, %v1381_v46, %v1366_v49  ;;  %vm1384_vm0 = vcmp.eq.s32.totalorder %v2247_v4, %v1381_v46 }
0x1427   :  { %v1385_v26 = vsel %vm1384_vm0, %v1161_v15, 0  ;;  %v1104_v21 = vpop.xlane.xlu1 %1103 }
0x1428   :  { %v1386_v0 = vrot.slane %v1385_v26, 4  ;;  %vm1105_vm7 = vcmp.eq.f32.partialorder %v1102_v56, %v1104_v21  ;;  %v1110_v55 = vcvt.f32.s32 %v1104_v21 }
0x1429   :  { %v1106_v42 = vsel %vm1105_vm7, %v1101_v27, inf }
0x142a   :  { %v1387_v1 = vadd.s32 %v1386_v0, %v1385_v26  ;;  %1107 = vmin.xlane.f32.xlu1 %v1106_v42  ;;  %v1111_v43 = vshll.u32 %v1110_v55, 16 }
0x142c   :  { %v1388_v22 = vrot.slane %v1387_v1, 2 }
0x142e   :  { %v1389_v57 = vadd.s32 %v1388_v22, %v1387_v1 }
0x1430   :  { %v1390_v2 = vrot.slane %v1389_v57, 1 }
0x1432   :  { %v1391_v3 = vadd.s32 %v1390_v2, %v1389_v57 }
0x1434   :  { %vm1394_vm1 = vcmp.eq.s32.totalorder %v2152_v11, %v1391_v3  ;;  %v1393_v17 = vsel %vm1392_vm10, %v1391_v3, %v1383_v19 }
0x1435   :  { %v1395_v20 = vsel %vm1394_vm1, %v1138_v6, 0 }
0x1436   :  { %v1396_v25 = vsel %vm1092_vm5, %v1395_v20, 0  ;;  %vm1409_vm5 = vcmp.eq.s32.totalorder %v2152_v11, 0 }
0x1437   :  { %v1398_v28 = vshrl.u32 %v1396_v25, 16  ;;  %v1397_v29 = vand.u32 65535, %v1396_v25 }
0x1439   :  { %v1400_v9 = vcvt.s32.f32 %v1398_v28  ;;  %v1399_v23 = vcvt.s32.f32 %v1397_v29 }
0x143b   :  { %1403 = vadd.xlane.f32.xlu2 %v1400_v9  ;;  %1401 = vadd.xlane.f32.xlu0 %v1399_v23 }
0x149d   :  { %v1108_v32 = vpop.xlane.xlu1 %1107 }
0x149e   :  { %v1109_v37 = vcvt.f32.s32 %v1108_v32 }
0x14a0   :  { %v1112_v45 = vadd.s32 %v1111_v43, %v1109_v37 }
0x14ae   :  { %v1404_v63 = vpop.xlane.xlu2 %1403  ;;  %v1402_v35 = vpop.xlane.xlu0 %1401 }
0x14af   :  { %v1406_v39 = vcvt.f32.s32 %v1404_v63  ;;  %v1405_v41 = vcvt.f32.s32 %v1402_v35 }
0x14b1   :  { %v1407_v38 = vshll.u32 %v1406_v39, 16 }
0x14b3   :  { %v1408_v44 = vadd.s32 %v1407_v38, %v1405_v41 }
0x14b5   :  { %vm1411_vm13 = vcmp.eq.s32.totalorder %v2247_v4, %v1408_v44  ;;  %v1410_v47 = vsel %vm1409_vm5, %v1408_v44, %v1393_v17 }
0x14b6   :  { %v1412_v48 = vsel %vm1411_vm13, %v1112_v45, 0  ;;  %1419 = vst.msk [vmem:[#allocation6 - $0x7] sm:$0x80] %vm1288_vm15, %v1410_v47 }
0x14b7   :  { %v1413_v49 = vrot.slane %v1412_v48, 4  ;;  %1443 = dma.vmem_to_hbm [thread:$0]  %s1439_s12, 16, %s1441_s15, [#allocation7]  }
0x14b9   :  { %v1414_v50 = vadd.s32 %v1413_v49, %v1412_v48 }
0x14bb   :  { %v1415_v34 = vrot.slane %v1414_v50, 2 }
0x14bd   :  { %v1416_v18 = vadd.s32 %v1415_v34, %v1414_v50 }
0x14bf   :  { %v1417_v11 = vrot.slane %v1416_v18, 1 }
0x14c1   :  { %v1418_v7 = vadd.s32 %v1417_v11, %v1416_v18 }
0x14c3   :  { %1421 = vst.msk [vmem:[#allocation8] sm:$0x1] %vm1420_vm9, %v1418_v7 }
0x14c4   :  { %1454 = dma.vmem_to_hbm [thread:$0]  %s1450_s9, 16, %s1452_s18, [#allocation7]  }
0x14c5   :  { %1708 = dma.done.wait [#allocation4], 16  }
0x14c6   :  { %1709 = vsyncadd [#allocation4], 4294967280 }
0x14c7   :  { %1710 = dma.done.wait [#allocation7], 32  }
0x14c8   :  { %1711 = vsyncadd [#allocation7], 4294967264 }
0x14c9   :  { %1467 = vsyncpa [#allocation3], 1 }
0x14ca   :  { %1468 = vsyncpa [#allocation4], 1 }
0x14cb   :  { %1469 = vsyncpa [#allocation7], 1 }

</bundles_post_ra>
